<compile_context>
chip_gen: v6e
topology: v6e:2x2x1
jax: 0.10.0
libtpu: 0.0.40
codegen_flags: <defaults>
</compile_context>

<pallas_src>
import jax
import jax.numpy as jnp
import numpy as np
from jax.experimental import pallas as pl
from jax.experimental.pallas import tpu as pltpu


def _make_kernel(Wp, P, E, c_mid, c_out, add):
    """Fused Bottleneck kernel for one image per grid step (spatial on lanes)."""

    def silu(v):  # v: f32
        # exp and approx reciprocal both go to the EUP slot (VPU stays free).
        return v * pl.reciprocal(1.0 + jnp.exp(-v), approx=True)

    def conv3x3(src_ref, w_ref):
        # src_ref: (Cin, Np) bf16 padded-flat activation with >= Wp+1 zero halo.
        # w_ref  : (3, Cout, 3*Cin) bf16, contraction row r = dx*Cin + ci.
        acc = None
        for dy in range(3):
            base = E + (dy - 1) * Wp - 1                     # static offsets
            cols = jnp.concatenate(
                [src_ref[:, pl.ds(base + dx, P)] for dx in range(3)], axis=0)
            part = jnp.dot(w_ref[dy], cols, preferred_element_type=jnp.float32)
            acc = part if acc is None else acc + part        # init with first dot
        return acc

    def kernel(x_ref, w1_ref, b1_ref, w2_ref, b2_ref, mask_ref, o_ref, y1_ref):
        # x_ref   : (C1, Np)   bf16  halo'd padded-flat input (spatial on lanes)
        # w1_ref  : (3, c_mid, 3*C1)   bf16 ; b1_ref: (c_mid, 1) f32
        # w2_ref  : (3, c_out, 3*c_mid) bf16 ; b2_ref: (c_out, 1) f32
        # mask_ref: (1, P) f32  1.0 on the interior of the padded image, 0.0 on ring
        # o_ref   : (c_out, P) f32  padded-flat output (interior sliced by wrapper)
        # y1_ref  : (c_mid, Np) bf16 VMEM scratch for the intermediate activation
        Np = y1_ref.shape[1]
        Eh = Np - E - P
        # Zero only the scratch halo; the interior [E, E+P) is fully overwritten below.
        y1_ref[:, pl.ds(0, E)] = jnp.zeros((c_mid, E), y1_ref.dtype)
        y1_ref[:, pl.ds(E + P, Eh)] = jnp.zeros((c_mid, Eh), y1_ref.dtype)

        # ---- cv1: conv3x3 + folded BN + SiLU ---------------------------------
        a1 = conv3x3(x_ref, w1_ref) + b1_ref[...]
        y1 = silu(a1) * mask_ref[...]        # zero the pad ring -> cv2 sees zero padding
        y1_ref[:, pl.ds(E, P)] = y1.astype(y1_ref.dtype)

        # ---- cv2: conv3x3 + folded BN + SiLU ---------------------------------
        a2 = conv3x3(y1_ref, w2_ref) + b2_ref[...]
        y2 = silu(a2)
        if add:
            y2 = y2 + x_ref[:, pl.ds(E, P)].astype(jnp.float32)   # residual (c1 == c2)
        o_ref[...] = y2.astype(o_ref.dtype)

    return kernel


def bottleneck_forward(x_nchw, params, *, shortcut=True, eps=1e-5):
    """x_nchw: (B, C1, H, W) float32.  params: HWIO conv weights + BN params."""
    w1, g1, be1, m1, v1 = (params[k] for k in ("w1", "g1", "b1", "m1", "v1"))
    w2, g2, be2, m2, v2 = (params[k] for k in ("w2", "g2", "b2", "m2", "v2"))

    B, C1, H, W = x_nchw.shape
    c_mid = w1.shape[-1]
    c_out = w2.shape[-1]
    add = bool(shortcut and (C1 == c_out))

    # ---- fold inference BatchNorm into conv weights / bias --------------------
    s1 = g1 / jnp.sqrt(v1 + eps)
    s2 = g2 / jnp.sqrt(v2 + eps)
    w1f = w1 * s1[None, None, None, :]
    w2f = w2 * s2[None, None, None, :]
    b1k = (be1 - m1 * s1).reshape(c_mid, 1).astype(jnp.float32)
    b2k = (be2 - m2 * s2).reshape(c_out, 1).astype(jnp.float32)

    # Weights: HWIO (dy, dx, ci, co) -> (dy, co, dx*Cin + ci): K merged over (dx, ci).
    w1k = jnp.transpose(w1f, (0, 3, 1, 2)).reshape(3, c_mid, 3 * C1).astype(jnp.bfloat16)
    w2k = jnp.transpose(w2f, (0, 3, 1, 2)).reshape(3, c_out, 3 * c_mid).astype(jnp.bfloat16)

    # ---- channel-major padded-flat input (no transpose needed from NCHW) ------
    Hp, Wp = H + 2, W + 2
    P = Hp * Wp
    E = 2 * Wp            # flat-axis halo: every tap read (offsets within +-Wp+1) stays in bounds
    # Single pad: H by (3,3), W by (1,1).  Rows [2, 2+Hp) hold the canonical 1-padded image,
    # so the canonical padded-flat position p lives at extended-flat index E + p.
    x_pad = jnp.pad(x_nchw, ((0, 0), (0, 0), (3, 3), (1, 1)))
    Np = (H + 6) * Wp
    x_ext = x_pad.reshape(B, C1, Np).astype(jnp.bfloat16)

    # interior mask over padded-flat positions (lane vector)
    r = jnp.arange(Hp)[:, None]
    c = jnp.arange(Wp)[None, :]
    mask = (((r >= 1) & (r <= H)) & ((c >= 1) & (c <= W))).astype(jnp.float32).reshape(1, P)

    kernel = _make_kernel(Wp, P, E, c_mid, c_out, add)

    out_flat = pl.pallas_call(
        kernel,
        out_shape=jax.ShapeDtypeStruct((B, c_out, P), jnp.float32),
        grid_spec=pltpu.PrefetchScalarGridSpec(
            num_scalar_prefetch=0,
            grid=(B,),
            in_specs=[
                pl.BlockSpec((None, C1, Np), lambda i: (i, 0, 0)),         # x (batch squeezed)
                pl.BlockSpec((3, c_mid, 3 * C1), lambda i: (0, 0, 0)),     # w1 (K-merged)
                pl.BlockSpec((c_mid, 1), lambda i: (0, 0)),                # b1
                pl.BlockSpec((3, c_out, 3 * c_mid), lambda i: (0, 0, 0)),  # w2 (K-merged)
                pl.BlockSpec((c_out, 1), lambda i: (0, 0)),                # b2
                pl.BlockSpec((1, P), lambda i: (0, 0)),                    # interior mask
            ],
            out_specs=pl.BlockSpec((None, c_out, P), lambda i: (i, 0, 0)),
            scratch_shapes=[pltpu.VMEM((c_mid, Np), jnp.bfloat16)],
        ),
        compiler_params=pltpu.CompilerParams(
            dimension_semantics=("parallel",),
            vmem_limit_bytes=32 * 1024 * 1024,
        ),
    )(x_ext, w1k, b1k, w2k, b2k, mask)

    # (B, c_out, P) -> (B, c_out, H, W): already channel-major (NCHW), just slice interior.
    out = out_flat.reshape(B, c_out, Hp, Wp)[:, :, 1:H + 1, 1:W + 1]
    return out


def bottleneck_reference(x_nchw, params, *, shortcut=True, eps=1e-5):
    """Pure-JAX reference mirroring the PyTorch module (eval-mode BN)."""
    x = jnp.transpose(x_nchw, (0, 2, 3, 1))   # NHWC

    def conv_bn_silu(h, w, gamma, beta, mean, var):
        y = jax.lax.conv_general_dilated(
            h, w, window_strides=(1, 1), padding=((1, 1), (1, 1)),
            dimension_numbers=("NHWC", "HWIO", "NHWC"),
            precision=jax.lax.Precision.HIGHEST)
        y = (y - mean) * (gamma / jnp.sqrt(var + eps)) + beta
        return y * jax.nn.sigmoid(y)

    y = conv_bn_silu(x, params["w1"], params["g1"], params["b1"], params["m1"], params["v1"])
    y = conv_bn_silu(y, params["w2"], params["g2"], params["b2"], params["m2"], params["v2"])
    out = x + y if (shortcut and x.shape[-1] == y.shape[-1]) else y
    return jnp.transpose(out, (0, 3, 1, 2))


if __name__ == "__main__":
    B, C1, C2, H, W = 2, 32, 32, 16, 16
    e = 0.5
    c_mid = int(C2 * e)

    key = jax.random.PRNGKey(0)
    ks = jax.random.split(key, 11)

    x = jax.random.normal(ks[0], (B, C1, H, W), dtype=jnp.float32)

    params = {
        "w1": jax.random.normal(ks[1], (3, 3, C1, c_mid), jnp.float32) * (1.0 / np.sqrt(9 * C1)),
        "g1": jax.random.uniform(ks[2], (c_mid,), jnp.float32, 0.5, 1.5),
        "b1": jax.random.normal(ks[3], (c_mid,), jnp.float32) * 0.1,
        "m1": jax.random.normal(ks[4], (c_mid,), jnp.float32) * 0.1,
        "v1": jax.random.uniform(ks[5], (c_mid,), jnp.float32, 0.5, 1.5),
        "w2": jax.random.normal(ks[6], (3, 3, c_mid, C2), jnp.float32) * (1.0 / np.sqrt(9 * c_mid)),
        "g2": jax.random.uniform(ks[7], (C2,), jnp.float32, 0.5, 1.5),
        "b2": jax.random.normal(ks[8], (C2,), jnp.float32) * 0.1,
        "m2": jax.random.normal(ks[9], (C2,), jnp.float32) * 0.1,
        "v2": jax.random.uniform(ks[10], (C2,), jnp.float32, 0.5, 1.5),
    }

    fwd = jax.jit(lambda xx: bottleneck_forward(xx, params, shortcut=True))
    out = jax.block_until_ready(fwd(x))

    ref = jax.block_until_ready(bottleneck_reference(x, params, shortcut=True))

    # bf16 matmul operands + approx reciprocal -> slightly looser tolerance than f32.
    np.testing.assert_allclose(np.asarray(out), np.asarray(ref), rtol=3e-2, atol=3e-2)
    assert out.shape == (B, C2, H, W)

    print("KERNEL_OK")
</pallas_src>

<mosaic_0001>
module attributes {stable_mosaic.version = 11 : i64} {
  func.func @kernel(%arg0: i32, %arg1: memref<1x32x396xbf16, #tpu.memory_space<vmem>>, %arg2: memref<3x16x96xbf16, #tpu.memory_space<vmem>>, %arg3: memref<16x1xf32, #tpu.memory_space<vmem>>, %arg4: memref<3x32x48xbf16, #tpu.memory_space<vmem>>, %arg5: memref<32x1xf32, #tpu.memory_space<vmem>>, %arg6: memref<1x324xf32, #tpu.memory_space<vmem>>, %arg7: memref<1x32x324xf32, #tpu.memory_space<vmem>>, %arg8: memref<16x396xbf16, #tpu.memory_space<vmem>>) attributes {dimension_semantics = [#tpu.dimension_semantics<parallel>], iteration_bounds = array<i64: 2>, scalar_prefetch = 0 : i64, scratch_operands = 1 : i64, tpu.core_type = #tpu.core_type<tc>, window_params = [{transform_indices = @transform_0, window_bounds = array<i64: 1, 32, 396>}, {pipeline_mode = #tpu.pipeline_mode<synchronous>, transform_indices = @transform_1, window_bounds = array<i64: 3, 16, 96>}, {pipeline_mode = #tpu.pipeline_mode<synchronous>, transform_indices = @transform_2, window_bounds = array<i64: 16, 1>}, {pipeline_mode = #tpu.pipeline_mode<synchronous>, transform_indices = @transform_3, window_bounds = array<i64: 3, 32, 48>}, {pipeline_mode = #tpu.pipeline_mode<synchronous>, transform_indices = @transform_4, window_bounds = array<i64: 32, 1>}, {pipeline_mode = #tpu.pipeline_mode<synchronous>, transform_indices = @transform_5, window_bounds = array<i64: 1, 324>}, {transform_indices = @transform_6, window_bounds = array<i64: 1, 32, 324>}]} {
    %cst = arith.constant 0.000000e+00 : bf16
    %0 = vector.broadcast %cst : bf16 to vector<16x36xbf16>
    %c0 = arith.constant 0 : index
    %c0_0 = arith.constant 0 : index
    %1 = vector.load %arg8[%c0, %c0_0] : memref<16x396xbf16, #tpu.memory_space<vmem>>, vector<16x36xbf16>
    tpu.vector_store %arg8[%c0, %c0_0], %0 {strides = array<i32>} : memref<16x396xbf16, #tpu.memory_space<vmem>>, vector<16x36xbf16>,
    %cst_1 = arith.constant 0.000000e+00 : bf16
    %2 = vector.broadcast %cst_1 : bf16 to vector<16x36xbf16>
    %c0_2 = arith.constant 0 : index
    %c360 = arith.constant 360 : index
    %3 = vector.load %arg8[%c0_2, %c360] : memref<16x396xbf16, #tpu.memory_space<vmem>>, vector<16x36xbf16>
    tpu.vector_store %arg8[%c0_2, %c360], %2 {strides = array<i32>} : memref<16x396xbf16, #tpu.memory_space<vmem>>, vector<16x36xbf16>,
    %c0_3 = arith.constant 0 : index
    %c0_4 = arith.constant 0 : index
    %c17 = arith.constant 17 : index
    %4 = vector.load %arg1[%c0_3, %c0_4, %c17] : memref<1x32x396xbf16, #tpu.memory_space<vmem>>, vector<1x32x324xbf16>
    %5 = vector.shape_cast %4 : vector<1x32x324xbf16> to vector<32x324xbf16>
    %c0_5 = arith.constant 0 : index
    %c0_6 = arith.constant 0 : index
    %c18 = arith.constant 18 : index
    %6 = vector.load %arg1[%c0_5, %c0_6, %c18] : memref<1x32x396xbf16, #tpu.memory_space<vmem>>, vector<1x32x324xbf16>
    %7 = vector.shape_cast %6 : vector<1x32x324xbf16> to vector<32x324xbf16>
    %c0_7 = arith.constant 0 : index
    %c0_8 = arith.constant 0 : index
    %c19 = arith.constant 19 : index
    %8 = vector.load %arg1[%c0_7, %c0_8, %c19] : memref<1x32x396xbf16, #tpu.memory_space<vmem>>, vector<1x32x324xbf16>
    %9 = vector.shape_cast %8 : vector<1x32x324xbf16> to vector<32x324xbf16>
    %10 = tpu.concatenate %5, %7, %9 in 0 : vector<32x324xbf16>, vector<32x324xbf16>, vector<32x324xbf16> -> vector<96x324xbf16>
    %c0_9 = arith.constant 0 : index
    %c0_10 = arith.constant 0 : index
    %c0_11 = arith.constant 0 : index
    %11 = vector.load %arg2[%c0_9, %c0_10, %c0_11] : memref<3x16x96xbf16, #tpu.memory_space<vmem>>, vector<1x16x96xbf16>
    %12 = vector.shape_cast %11 : vector<1x16x96xbf16> to vector<16x96xbf16>
    %cst_12 = arith.constant dense<0.000000e+00> : vector<16x324xf32>
    %13 = tpu.matmul %12, %10, %cst_12 {dimension_numbers = #tpu.dot_dimension_numbers<[1], [0], [0], [1], [0, 0, 1, 1], [], []>} : vector<16x96xbf16>, vector<96x324xbf16>, vector<16x324xf32> -> vector<16x324xf32>
    %c0_13 = arith.constant 0 : index
    %c0_14 = arith.constant 0 : index
    %c35 = arith.constant 35 : index
    %14 = vector.load %arg1[%c0_13, %c0_14, %c35] : memref<1x32x396xbf16, #tpu.memory_space<vmem>>, vector<1x32x324xbf16>
    %15 = vector.shape_cast %14 : vector<1x32x324xbf16> to vector<32x324xbf16>
    %c0_15 = arith.constant 0 : index
    %c0_16 = arith.constant 0 : index
    %c36 = arith.constant 36 : index
    %16 = vector.load %arg1[%c0_15, %c0_16, %c36] : memref<1x32x396xbf16, #tpu.memory_space<vmem>>, vector<1x32x324xbf16>
    %17 = vector.shape_cast %16 : vector<1x32x324xbf16> to vector<32x324xbf16>
    %c0_17 = arith.constant 0 : index
    %c0_18 = arith.constant 0 : index
    %c37 = arith.constant 37 : index
    %18 = vector.load %arg1[%c0_17, %c0_18, %c37] : memref<1x32x396xbf16, #tpu.memory_space<vmem>>, vector<1x32x324xbf16>
    %19 = vector.shape_cast %18 : vector<1x32x324xbf16> to vector<32x324xbf16>
    %20 = tpu.concatenate %15, %17, %19 in 0 : vector<32x324xbf16>, vector<32x324xbf16>, vector<32x324xbf16> -> vector<96x324xbf16>
    %c1 = arith.constant 1 : index
    %c0_19 = arith.constant 0 : index
    %c0_20 = arith.constant 0 : index
    %21 = vector.load %arg2[%c1, %c0_19, %c0_20] : memref<3x16x96xbf16, #tpu.memory_space<vmem>>, vector<1x16x96xbf16>
    %22 = vector.shape_cast %21 : vector<1x16x96xbf16> to vector<16x96xbf16>
    %cst_21 = arith.constant dense<0.000000e+00> : vector<16x324xf32>
    %23 = tpu.matmul %22, %20, %cst_21 {dimension_numbers = #tpu.dot_dimension_numbers<[1], [0], [0], [1], [0, 0, 1, 1], [], []>} : vector<16x96xbf16>, vector<96x324xbf16>, vector<16x324xf32> -> vector<16x324xf32>
    %24 = arith.addf %13, %23 : vector<16x324xf32>
    %c0_22 = arith.constant 0 : index
    %c0_23 = arith.constant 0 : index
    %c53 = arith.constant 53 : index
    %25 = vector.load %arg1[%c0_22, %c0_23, %c53] : memref<1x32x396xbf16, #tpu.memory_space<vmem>>, vector<1x32x324xbf16>
    %26 = vector.shape_cast %25 : vector<1x32x324xbf16> to vector<32x324xbf16>
    %c0_24 = arith.constant 0 : index
    %c0_25 = arith.constant 0 : index
    %c54 = arith.constant 54 : index
    %27 = vector.load %arg1[%c0_24, %c0_25, %c54] : memref<1x32x396xbf16, #tpu.memory_space<vmem>>, vector<1x32x324xbf16>
    %28 = vector.shape_cast %27 : vector<1x32x324xbf16> to vector<32x324xbf16>
    %c0_26 = arith.constant 0 : index
    %c0_27 = arith.constant 0 : index
    %c55 = arith.constant 55 : index
    %29 = vector.load %arg1[%c0_26, %c0_27, %c55] : memref<1x32x396xbf16, #tpu.memory_space<vmem>>, vector<1x32x324xbf16>
    %30 = vector.shape_cast %29 : vector<1x32x324xbf16> to vector<32x324xbf16>
    %31 = tpu.concatenate %26, %28, %30 in 0 : vector<32x324xbf16>, vector<32x324xbf16>, vector<32x324xbf16> -> vector<96x324xbf16>
    %c2 = arith.constant 2 : index
    %c0_28 = arith.constant 0 : index
    %c0_29 = arith.constant 0 : index
    %32 = vector.load %arg2[%c2, %c0_28, %c0_29] : memref<3x16x96xbf16, #tpu.memory_space<vmem>>, vector<1x16x96xbf16>
    %33 = vector.shape_cast %32 : vector<1x16x96xbf16> to vector<16x96xbf16>
    %cst_30 = arith.constant dense<0.000000e+00> : vector<16x324xf32>
    %34 = tpu.matmul %33, %31, %cst_30 {dimension_numbers = #tpu.dot_dimension_numbers<[1], [0], [0], [1], [0, 0, 1, 1], [], []>} : vector<16x96xbf16>, vector<96x324xbf16>, vector<16x324xf32> -> vector<16x324xf32>
    %35 = arith.addf %24, %34 : vector<16x324xf32>
    %c0_31 = arith.constant 0 : index
    %c0_32 = arith.constant 0 : index
    %36 = vector.load %arg3[%c0_31, %c0_32] : memref<16x1xf32, #tpu.memory_space<vmem>>, vector<16x1xf32>
    %37 = vector.broadcast %36 : vector<16x1xf32> to vector<16x324xf32>
    %38 = arith.addf %35, %37 : vector<16x324xf32>
    %cst_33 = arith.constant 0.000000e+00 : f32
    %39 = vector.broadcast %cst_33 : f32 to vector<16x324xf32>
    %40 = arith.subf %39, %38 : vector<16x324xf32>
    %41 = math.exp %40 : vector<16x324xf32>
    %cst_34 = arith.constant 1.000000e+00 : f32
    %42 = vector.broadcast %cst_34 : f32 to vector<16x324xf32>
    %43 = arith.addf %42, %41 : vector<16x324xf32>
    %44 = tpu.reciprocal %43 {approx = true} : vector<16x324xf32> -> vector<16x324xf32>
    %45 = arith.mulf %38, %44 : vector<16x324xf32>
    %c0_35 = arith.constant 0 : index
    %c0_36 = arith.constant 0 : index
    %46 = vector.load %arg6[%c0_35, %c0_36] : memref<1x324xf32, #tpu.memory_space<vmem>>, vector<1x324xf32>
    %47 = vector.broadcast %46 : vector<1x324xf32> to vector<16x324xf32>
    %48 = arith.mulf %45, %47 : vector<16x324xf32>
    %49 = arith.truncf %48 : vector<16x324xf32> to vector<16x324xbf16>
    %c0_37 = arith.constant 0 : index
    %c36_38 = arith.constant 36 : index
    %50 = vector.load %arg8[%c0_37, %c36_38] : memref<16x396xbf16, #tpu.memory_space<vmem>>, vector<16x324xbf16>
    tpu.vector_store %arg8[%c0_37, %c36_38], %49 {strides = array<i32>} : memref<16x396xbf16, #tpu.memory_space<vmem>>, vector<16x324xbf16>,
    %c0_39 = arith.constant 0 : index
    %c17_40 = arith.constant 17 : index
    %51 = vector.load %arg8[%c0_39, %c17_40] : memref<16x396xbf16, #tpu.memory_space<vmem>>, vector<16x324xbf16>
    %c0_41 = arith.constant 0 : index
    %c18_42 = arith.constant 18 : index
    %52 = vector.load %arg8[%c0_41, %c18_42] : memref<16x396xbf16, #tpu.memory_space<vmem>>, vector<16x324xbf16>
    %c0_43 = arith.constant 0 : index
    %c19_44 = arith.constant 19 : index
    %53 = vector.load %arg8[%c0_43, %c19_44] : memref<16x396xbf16, #tpu.memory_space<vmem>>, vector<16x324xbf16>
    %54 = tpu.concatenate %51, %52, %53 in 0 : vector<16x324xbf16>, vector<16x324xbf16>, vector<16x324xbf16> -> vector<48x324xbf16>
    %c0_45 = arith.constant 0 : index
    %c0_46 = arith.constant 0 : index
    %c0_47 = arith.constant 0 : index
    %55 = vector.load %arg4[%c0_45, %c0_46, %c0_47] : memref<3x32x48xbf16, #tpu.memory_space<vmem>>, vector<1x32x48xbf16>
    %56 = vector.shape_cast %55 : vector<1x32x48xbf16> to vector<32x48xbf16>
    %cst_48 = arith.constant dense<0.000000e+00> : vector<32x324xf32>
    %57 = tpu.matmul %56, %54, %cst_48 {dimension_numbers = #tpu.dot_dimension_numbers<[1], [0], [0], [1], [0, 0, 1, 1], [], []>} : vector<32x48xbf16>, vector<48x324xbf16>, vector<32x324xf32> -> vector<32x324xf32>
    %c0_49 = arith.constant 0 : index
    %c35_50 = arith.constant 35 : index
    %58 = vector.load %arg8[%c0_49, %c35_50] : memref<16x396xbf16, #tpu.memory_space<vmem>>, vector<16x324xbf16>
    %c0_51 = arith.constant 0 : index
    %c36_52 = arith.constant 36 : index
    %59 = vector.load %arg8[%c0_51, %c36_52] : memref<16x396xbf16, #tpu.memory_space<vmem>>, vector<16x324xbf16>
    %c0_53 = arith.constant 0 : index
    %c37_54 = arith.constant 37 : index
    %60 = vector.load %arg8[%c0_53, %c37_54] : memref<16x396xbf16, #tpu.memory_space<vmem>>, vector<16x324xbf16>
    %61 = tpu.concatenate %58, %59, %60 in 0 : vector<16x324xbf16>, vector<16x324xbf16>, vector<16x324xbf16> -> vector<48x324xbf16>
    %c1_55 = arith.constant 1 : index
    %c0_56 = arith.constant 0 : index
    %c0_57 = arith.constant 0 : index
    %62 = vector.load %arg4[%c1_55, %c0_56, %c0_57] : memref<3x32x48xbf16, #tpu.memory_space<vmem>>, vector<1x32x48xbf16>
    %63 = vector.shape_cast %62 : vector<1x32x48xbf16> to vector<32x48xbf16>
    %cst_58 = arith.constant dense<0.000000e+00> : vector<32x324xf32>
    %64 = tpu.matmul %63, %61, %cst_58 {dimension_numbers = #tpu.dot_dimension_numbers<[1], [0], [0], [1], [0, 0, 1, 1], [], []>} : vector<32x48xbf16>, vector<48x324xbf16>, vector<32x324xf32> -> vector<32x324xf32>
    %65 = arith.addf %57, %64 : vector<32x324xf32>
    %c0_59 = arith.constant 0 : index
    %c53_60 = arith.constant 53 : index
    %66 = vector.load %arg8[%c0_59, %c53_60] : memref<16x396xbf16, #tpu.memory_space<vmem>>, vector<16x324xbf16>
    %c0_61 = arith.constant 0 : index
    %c54_62 = arith.constant 54 : index
    %67 = vector.load %arg8[%c0_61, %c54_62] : memref<16x396xbf16, #tpu.memory_space<vmem>>, vector<16x324xbf16>
    %c0_63 = arith.constant 0 : index
    %c55_64 = arith.constant 55 : index
    %68 = vector.load %arg8[%c0_63, %c55_64] : memref<16x396xbf16, #tpu.memory_space<vmem>>, vector<16x324xbf16>
    %69 = tpu.concatenate %66, %67, %68 in 0 : vector<16x324xbf16>, vector<16x324xbf16>, vector<16x324xbf16> -> vector<48x324xbf16>
    %c2_65 = arith.constant 2 : index
    %c0_66 = arith.constant 0 : index
    %c0_67 = arith.constant 0 : index
    %70 = vector.load %arg4[%c2_65, %c0_66, %c0_67] : memref<3x32x48xbf16, #tpu.memory_space<vmem>>, vector<1x32x48xbf16>
    %71 = vector.shape_cast %70 : vector<1x32x48xbf16> to vector<32x48xbf16>
    %cst_68 = arith.constant dense<0.000000e+00> : vector<32x324xf32>
    %72 = tpu.matmul %71, %69, %cst_68 {dimension_numbers = #tpu.dot_dimension_numbers<[1], [0], [0], [1], [0, 0, 1, 1], [], []>} : vector<32x48xbf16>, vector<48x324xbf16>, vector<32x324xf32> -> vector<32x324xf32>
    %73 = arith.addf %65, %72 : vector<32x324xf32>
    %c0_69 = arith.constant 0 : index
    %c0_70 = arith.constant 0 : index
    %74 = vector.load %arg5[%c0_69, %c0_70] : memref<32x1xf32, #tpu.memory_space<vmem>>, vector<32x1xf32>
    %75 = vector.broadcast %74 : vector<32x1xf32> to vector<32x324xf32>
    %76 = arith.addf %73, %75 : vector<32x324xf32>
    %cst_71 = arith.constant 0.000000e+00 : f32
    %77 = vector.broadcast %cst_71 : f32 to vector<32x324xf32>
    %78 = arith.subf %77, %76 : vector<32x324xf32>
    %79 = math.exp %78 : vector<32x324xf32>
    %cst_72 = arith.constant 1.000000e+00 : f32
    %80 = vector.broadcast %cst_72 : f32 to vector<32x324xf32>
    %81 = arith.addf %80, %79 : vector<32x324xf32>
    %82 = tpu.reciprocal %81 {approx = true} : vector<32x324xf32> -> vector<32x324xf32>
    %83 = arith.mulf %76, %82 : vector<32x324xf32>
    %c0_73 = arith.constant 0 : index
    %c0_74 = arith.constant 0 : index
    %c36_75 = arith.constant 36 : index
    %84 = vector.load %arg1[%c0_73, %c0_74, %c36_75] : memref<1x32x396xbf16, #tpu.memory_space<vmem>>, vector<1x32x324xbf16>
    %85 = vector.shape_cast %84 : vector<1x32x324xbf16> to vector<32x324xbf16>
    %86 = arith.extf %85 : vector<32x324xbf16> to vector<32x324xf32>
    %87 = arith.addf %83, %86 : vector<32x324xf32>
    %c0_76 = arith.constant 0 : index
    %c0_77 = arith.constant 0 : index
    %c0_78 = arith.constant 0 : index
    %88 = vector.load %arg7[%c0_76, %c0_77, %c0_78] : memref<1x32x324xf32, #tpu.memory_space<vmem>>, vector<1x32x324xf32>
    %89 = vector.shape_cast %88 : vector<1x32x324xf32> to vector<32x324xf32>
    %90 = vector.shape_cast %87 : vector<32x324xf32> to vector<1x32x324xf32>
    tpu.vector_store %arg7[%c0_76, %c0_77, %c0_78], %90 {strides = array<i32>} : memref<1x32x324xf32, #tpu.memory_space<vmem>>, vector<1x32x324xf32>,
    return
  }
  func.func @transform_0(%arg0: i32) -> (i32, i32, i32) {
    %c0_i32 = arith.constant 0 : i32
    %c0_i32_0 = arith.constant 0 : i32
    %c0_i32_1 = arith.constant 0 : i32
    return %arg0, %c0_i32, %c0_i32_0 : i32, i32, i32
  }
  func.func @transform_1(%arg0: i32) -> (i32, i32, i32) {
    %c0_i32 = arith.constant 0 : i32
    %c0_i32_0 = arith.constant 0 : i32
    %c0_i32_1 = arith.constant 0 : i32
    %c0_i32_2 = arith.constant 0 : i32
    return %c0_i32, %c0_i32_0, %c0_i32_1 : i32, i32, i32
  }
  func.func @transform_2(%arg0: i32) -> (i32, i32) {
    %c0_i32 = arith.constant 0 : i32
    %c0_i32_0 = arith.constant 0 : i32
    %c0_i32_1 = arith.constant 0 : i32
    return %c0_i32, %c0_i32_0 : i32, i32
  }
  func.func @transform_3(%arg0: i32) -> (i32, i32, i32) {
    %c0_i32 = arith.constant 0 : i32
    %c0_i32_0 = arith.constant 0 : i32
    %c0_i32_1 = arith.constant 0 : i32
    %c0_i32_2 = arith.constant 0 : i32
    return %c0_i32, %c0_i32_0, %c0_i32_1 : i32, i32, i32
  }
  func.func @transform_4(%arg0: i32) -> (i32, i32) {
    %c0_i32 = arith.constant 0 : i32
    %c0_i32_0 = arith.constant 0 : i32
    %c0_i32_1 = arith.constant 0 : i32
    return %c0_i32, %c0_i32_0 : i32, i32
  }
  func.func @transform_5(%arg0: i32) -> (i32, i32) {
    %c0_i32 = arith.constant 0 : i32
    %c0_i32_0 = arith.constant 0 : i32
    %c0_i32_1 = arith.constant 0 : i32
    return %c0_i32, %c0_i32_0 : i32, i32
  }
  func.func @transform_6(%arg0: i32) -> (i32, i32, i32) {
    %c0_i32 = arith.constant 0 : i32
    %c0_i32_0 = arith.constant 0 : i32
    %c0_i32_1 = arith.constant 0 : i32
    return %arg0, %c0_i32, %c0_i32_0 : i32, i32, i32
  }
}

</mosaic_0001>

<bundles_post_ra>
// kernel: _lambda_.1
= control target key start
LH: loop header
LB: loop body
LE: loop exit
PB: predicated region body
PF: predicated region fallthrough
CT: control target
= control target key end

     0   :  { %s2097_s21 = smov 0   ;;  %s2608_s0 = inlined_call_operand.vmem [shape: bf16[2,32,396], index: 0, kind: input, shape index: {}]   ;;  %s2609_s1 = inlined_call_operand.vmem [shape: bf16[3,16,96], index: 1, kind: input, shape index: {}]   ;;  %s2610_s2 = inlined_call_operand.vmem [shape: f32[16,1], index: 2, kind: input, shape index: {}]   ;;  %s2611_s3 = inlined_call_operand.vmem [shape: bf16[3,32,48], index: 3, kind: input, shape index: {}]   ;;  %s2612_s4 = inlined_call_operand.vmem [shape: f32[32,1], index: 4, kind: input, shape index: {}]   ;;  %s2613_s5 = inlined_call_operand.vmem [shape: f32[1,324], index: 5, kind: input, shape index: {}]   ;;  %s2614_s6 = inlined_call_operand.vmem [shape: f32[2,32,324], index: 6, kind: output, shape index: {}]  }
   0x1 LB: > { %s1719_s22 = sadd.s32 4294967295, %s2050_s21   ;;  %p1723_p0 = scmp.ge.s32.totalorder %s2050_s21, 1  ;;  %s2050_s21 = sphi %s2097_s21, %s16_s21  }
   0x2   : > { %p212_p1 = scmp.lt.s32.totalorder %s2050_s21, 3 }
   0x4   : > { %p213_p2 = pnand %p1723_p0, %p212_p1 }
   0x5   : > { %p242_p3 = scmp.lt.s32.totalorder (!%p213_p2), %s1719_s22, 1  ;;  %s2052_s27 = smov (!%p213_p2), 126  }
   0x6   : > { %216 = sbr.rel (%p213_p2) target bundleno = 1263 (0x4ef), region = 44  ;;  %s2053_s28 = smov (!%p213_p2), 127  }
   0x7   : > { %s2054_s29 = smov (!%p213_p2), 93   ;;  %s2055_s30 = smov (!%p213_p2), 111  }
   0x8   : > { %s2059_s7 = smov (!%p213_p2), 75   ;;  %s2060_s20 = smov (!%p213_p2), 36  }
   0xb   : > { %s2616_s22 = smov (!%p242_p3, %s1719_s22), 1  ;;  %v2056_v6 = vmov 0.0   ;;  %vm2057_vm0 = vmmov 0   ;;  %vm324_vm1 = vcmask 1031168   ;;  %vm307_vm2 = vcmask 1039360   ;;  %v822_v30 = vld [vmem:[%s2610_s2 + $0x8] sm:$0xff] }
   0xc   : > { %s1781_s23 = sshll.u32 %s2616_s22, 6  ;;  %1822 = vmatprep.subr.bf16.mxu1 %v2056_v6  ;;  %1834 = vmatprep.mubr.msk.bf16.mxu1 %vm2057_vm0, %v2056_v6  ;;  %v2058_v27 = vmov 0   ;;  %v821_v33 = vld [vmem:[%s2610_s2] sm:$0xff]  ;;  %v2280_v47 = vld [vmem:[%s2609_s1 + $0x8] sm:$0xff]   ;;  %vm406_vm3 = vcmask 785408   ;;  %vm375_vm4 = vcmask 760832  }
   0xd   : > { %s2111_s26 = scalar_lea.vmem %s2608_s0, %s1781_s23  ;;  %442 = vmatprep.mubr.bf16.mxu0 %v2058_v27  ;;  %1919 = vset.pattern.permute.xlu0 %v2058_v27  ;;  %vm535_vm5 = vcmask 908288   ;;  %vm697_vm6 = vcmask 613376   ;;  %vm253_vm7 = vcmask 289792   ;;  %vm256_vm8 = vcmask 1044288  }
   0xe   : > { %v2114_v0 = vld [vmem:[%s2111_s26 + $0x24] ss:$16 sps:$4 sm:$0xff]   ;;  %v2117_v1 = vld [vmem:[%s2111_s26 + $0x20] ss:$16 sps:$4 sm:$0xff]   ;;  %v2122_v2 = vld [vmem:[%s2111_s26 + $0x28] ss:$16 sps:$4 sm:$0xff]   ;;  %1920 = vset.pattern.permute.xlu1 %v2058_v27 }
   0xf   : > { %320 = vrot.lane.b32.xlu0 %v2114_v0, %s2052_s27  ;;  %318 = vrot.lane.b32.xlu1 %v2117_v1, %s2052_s27  ;;  %v2127_v3 = vld [vmem:[%s2111_s26 + $0x4] ss:$16 sps:$4 sm:$0xff]   ;;  %v2132_v4 = vld [vmem:[%s2111_s26 + $0x8] ss:$16 sps:$4 sm:$0xff]   ;;  %254 = vst.msk [vmem:[#allocation2] sm:$0xf] %vm253_vm7, %v2058_v27 }
  0x10   : > { %v2137_v5 = vld [vmem:[%s2111_s26] ss:$16 sps:$4 sm:$0xff]   ;;  %255 = vst.msk [vmem:[#allocation2 + $0x10] sm:$0xf] %vm253_vm7, %v2058_v27  ;;  %vm257_vm9 = vcmask 97284   ;;  %vm933_vm11 = vcmask 1043744  }
  0x11   : > { %vm258_vm10 = vmor %vm257_vm9, %vm256_vm8  ;;  %vm934_vm12 = vcmask 1047556   ;;  %vm924_vm13 = vcmask 293888   ;;  %vm937_vm15 = vcmask 846848  }
  0x12   : > { %259 = vst.msk [vmem:[#allocation2 + $0x8] sm:$0xff] %vm258_vm10, %v2058_v27  ;;  %260 = vst.msk [vmem:[#allocation2 + $0x18] sm:$0xff] %vm258_vm10, %v2058_v27 }
  0x13   : > { %322 = vrot.lane.b32.xlu0 %v2122_v2, %s2052_s27  ;;  %314 = vrot.lane.b32.xlu1 %v2127_v3, %s2052_s27  ;;  %vm935_vm14 = vmor %vm934_vm12, %vm933_vm11 }
  0x17   : > { %316 = vrot.lane.b32.xlu0 %v2132_v4, %s2052_s27  ;;  %312 = vrot.lane.b32.xlu1 %v2137_v5, %s2052_s27 }
  0x1b   : > { %303 = vrot.lane.b32.xlu0 %v2114_v0, %s2053_s28  ;;  %305 = vrot.lane.b32.xlu1 %v2122_v2, %s2053_s28 }
  0x1f   : > { %301 = vrot.lane.b32.xlu0 %v2117_v1, %s2053_s28  ;;  %297 = vrot.lane.b32.xlu1 %v2127_v3, %s2053_s28 }
  0x23   : > { %299 = vrot.lane.b32.xlu0 %v2132_v4, %s2053_s28  ;;  %295 = vrot.lane.b32.xlu1 %v2137_v5, %s2053_s28 }
  0x27   : > { %347 = vrot.lane.b32.xlu0 %v2114_v0, %s2054_s29  ;;  %349 = vrot.lane.b32.xlu1 %v2122_v2, %s2054_s29 }
  0x2b   : > { %345 = vrot.lane.b32.xlu0 %v2117_v1, %s2054_s29  ;;  %341 = vrot.lane.b32.xlu1 %v2127_v3, %s2054_s29 }
  0x2f   : > { %343 = vrot.lane.b32.xlu0 %v2132_v4, %s2054_s29  ;;  %339 = vrot.lane.b32.xlu1 %v2137_v5, %s2054_s29 }
  0x33   : > { %507 = vrot.lane.b32.xlu0 %v2114_v0, %s2055_s30  ;;  %509 = vrot.lane.b32.xlu1 %v2122_v2, %s2055_s30 }
  0x81   : > { %v321_v7 = vpop.permute.xlu0 %320  ;;  %v319_v8 = vpop.permute.xlu1 %318 }
  0x82   : > { %v327_v21 = vsel %vm324_vm1, %v319_v8, %v321_v7 }
  0x85   : > { %v323_v9 = vpop.permute.xlu0 %322  ;;  %v315_v10 = vpop.permute.xlu1 %314 }
  0x86   : > { %373 = vrot.lane.b32.xlu1 %v323_v9, %s2054_s29  ;;  %v328_v20 = vsel %vm324_vm1, %v321_v7, %v323_v9 }
  0x89   : > { %v317_v11 = vpop.permute.xlu0 %316  ;;  %v313_v12 = vpop.permute.xlu1 %312 }
  0x8a   : > { %367 = vrot.lane.b32.xlu0 %v317_v11, %s2054_s29  ;;  %v326_v17 = vsel %vm324_vm1, %v315_v10, %v317_v11  ;;  %v325_v18 = vsel %vm324_vm1, %v313_v12, %v315_v10 }
  0x8d   : > { %v304_v13 = vpop.permute.xlu0 %303  ;;  %v306_v14 = vpop.permute.xlu1 %305 }
  0x8e   : > { %361 = vrot.lane.b32.xlu1 %v306_v14, %s2054_s29  ;;  %v311_v25 = vsel %vm307_vm2, %v304_v13, %v306_v14 }
  0x91   : > { %v302_v15 = vpop.permute.xlu0 %301  ;;  %v298_v19 = vpop.permute.xlu1 %297 }
  0x92   : > { %533 = vrot.lane.b32.xlu1 %v323_v9, %s2055_s30  ;;  %v310_v26 = vsel %vm307_vm2, %v302_v15, %v304_v13 }
  0x95   : > { %v300_v16 = vpop.permute.xlu0 %299  ;;  %v296_v22 = vpop.permute.xlu1 %295 }
  0x96   : > { %355 = vrot.lane.b32.xlu0 %v300_v16, %s2054_s29  ;;  %521 = vrot.lane.b32.xlu1 %v306_v14, %s2055_s30  ;;  %v309_v23 = vsel %vm307_vm2, %v298_v19, %v300_v16  ;;  %v308_v24 = vsel %vm307_vm2, %v296_v22, %v298_v19 }
  0x99   : > { %v2233_v28 = vpop.permute.xlu1 %349  ;;  %v2239_v29 = vpop.permute.xlu0 %347 }
  0x9a   : > { %527 = vrot.lane.b32.xlu0 %v317_v11, %s2055_s30  ;;  %365 = vrot.lane.b32.xlu1 %v326_v17, %s2054_s29 }
  0x9d   : > { %v2246_v31 = vpop.permute.xlu1 %341  ;;  %v2250_v32 = vpop.permute.xlu0 %345 }
  0x9e   : > { %515 = vrot.lane.b32.xlu0 %v300_v16, %s2055_s30  ;;  %363 = vrot.lane.b32.xlu1 %v325_v18, %s2054_s29  ;;  %v378_v8 = vsel %vm375_vm4, %v2250_v32, %v2239_v29 }
  0xa1   : > { %v2255_v34 = vpop.permute.xlu1 %339  ;;  %v2257_v35 = vpop.permute.xlu0 %343 }
  0xa2   : > { %371 = vrot.lane.b32.xlu0 %v328_v20, %s2054_s29  ;;  %501 = vrot.lane.b32.xlu1 %v2127_v3, %s2055_s30  ;;  %v376_v12 = vsel %vm375_vm4, %v2255_v34, %v2246_v31 }
  0xa5   : > { %v2259_v36 = vpop.permute.xlu1 %509  ;;  %v2261_v37 = vpop.permute.xlu0 %507 }
  0xa6   : > { %369 = vrot.lane.b32.xlu0 %v327_v21, %s2054_s29  ;;  %353 = vrot.lane.b32.xlu1 %v309_v23, %s2054_s29 }
  0xaa   : > { %359 = vrot.lane.b32.xlu0 %v311_v25, %s2054_s29  ;;  %351 = vrot.lane.b32.xlu1 %v308_v24, %s2054_s29 }
  0xae   : > { %357 = vrot.lane.b32.xlu0 %v310_v26, %s2054_s29  ;;  %499 = vrot.lane.b32.xlu1 %v2137_v5, %s2055_s30 }
  0xb2   : > { %505 = vrot.lane.b32.xlu0 %v2117_v1, %s2055_s30  ;;  %695 = vrot.lane.b32.xlu1 %v323_v9, %s2059_s7  ;;  %v377_v9 = vsel %vm375_vm4, %v2246_v31, %v2257_v35 }
  0xb6   : > { %503 = vrot.lane.b32.xlu0 %v2132_v4, %s2055_s30  ;;  %525 = vrot.lane.b32.xlu1 %v326_v17, %s2055_s30 }
  0xba   : > { %531 = vrot.lane.b32.xlu0 %v328_v20, %s2055_s30  ;;  %523 = vrot.lane.b32.xlu1 %v325_v18, %s2055_s30 }
  0xbe   : > { %529 = vrot.lane.b32.xlu0 %v327_v21, %s2055_s30  ;;  %513 = vrot.lane.b32.xlu1 %v309_v23, %s2055_s30 }
  0xc2   : > { %519 = vrot.lane.b32.xlu0 %v311_v25, %s2055_s30  ;;  %511 = vrot.lane.b32.xlu1 %v308_v24, %s2055_s30 }
  0xc6   : > { %517 = vrot.lane.b32.xlu0 %v310_v26, %s2055_s30  ;;  %683 = vrot.lane.b32.xlu1 %v306_v14, %s2059_s7 }
  0xca   : > { %689 = vrot.lane.b32.xlu0 %v317_v11, %s2059_s7  ;;  %687 = vrot.lane.b32.xlu1 %v326_v17, %s2059_s7 }
  0xce   : > { %677 = vrot.lane.b32.xlu0 %v300_v16, %s2059_s7  ;;  %685 = vrot.lane.b32.xlu1 %v325_v18, %s2059_s7 }
  0xd2   : > { %693 = vrot.lane.b32.xlu0 %v328_v20, %s2059_s7  ;;  %671 = vrot.lane.b32.xlu1 %v2122_v2, %s2059_s7 }
  0xd6   : > { %691 = vrot.lane.b32.xlu0 %v327_v21, %s2059_s7  ;;  %675 = vrot.lane.b32.xlu1 %v309_v23, %s2059_s7 }
  0xda   : > { %681 = vrot.lane.b32.xlu0 %v311_v25, %s2059_s7  ;;  %673 = vrot.lane.b32.xlu1 %v308_v24, %s2059_s7 }
  0xde   : > { %679 = vrot.lane.b32.xlu0 %v310_v26, %s2059_s7  ;;  %663 = vrot.lane.b32.xlu1 %v2127_v3, %s2059_s7  ;;  %v379_v3 = vsel %vm375_vm4, %v2239_v29, %v2233_v28 }
  0xe2   : > { %669 = vrot.lane.b32.xlu0 %v2114_v0, %s2059_s7  ;;  %661 = vrot.lane.b32.xlu1 %v2137_v5, %s2059_s7  ;;  %v2318_v5 = vld [vmem:[%s2609_s1] sm:$0xff]  }
  0xe6   : > { %667 = vrot.lane.b32.xlu0 %v2117_v1, %s2059_s7  ;;  %830 = vperm.xlu1 %1920, %v822_v30   ;;  %v539_v30 = vsel %vm535_vm5, %v2261_v37, %v2259_v36 }
  0xea   : > { %665 = vrot.lane.b32.xlu0 %v2132_v4, %s2059_s7 }
  0xee   : > { %825 = vperm.xlu0 %1919, %v821_v33  }
  0xf8   : > { %v374_v38 = vpop.permute.xlu1 %373 }
  0xf9   : > { %1823 = vmatpush3.bf16.msra.mxu1 %v374_v38 }
  0xfa   : > { %1824 = vmatprep.subr.bf16.mxu1 %v2056_v6 }
  0xfc   : > { %v368_v39 = vpop.permute.xlu0 %367 }
  0xfd   : > { %1825 = vmatpush3.bf16.msra.mxu1 %v368_v39 }
  0xfe   : > { %1826 = vmatprep.subr.bf16.mxu1 %v2056_v6 }
 0x100   : > { %v362_v40 = vpop.permute.xlu1 %361 }
 0x101   : > { %1827 = vmatpush3.bf16.msra.mxu1 %v362_v40 }
 0x102   : > { %1828 = vmatprep.subr.bf16.mxu1 %v2056_v6 }
 0x104   : > { %v2266_v41 = vpop.permute.xlu1 %533 }
 0x108   : > { %v356_v42 = vpop.permute.xlu0 %355  ;;  %v2268_v43 = vpop.permute.xlu1 %521 }
 0x109   : > { %1829 = vmatpush3.bf16.msra.mxu1 %v356_v42 }
 0x10a   : > { %1830 = vmatprep.subr.bf16.mxu1 %v2056_v6 }
 0x10c   : > { %v2271_v44 = vpop.permute.xlu0 %527  ;;  %v366_v45 = vpop.permute.xlu1 %365 }
 0x10d   : > { %1831 = vmatpush3.bf16.msra.mxu1 %v2233_v28  ;;  %v385_v55 = vsel %vm375_vm4, %v366_v45, %v368_v39 }
 0x10e   : > { %1832 = vmatprep.subr.bf16.mxu1 %v2056_v6 }
 0x110   : > { %v2275_v46 = vpop.permute.xlu0 %515  ;;  %v364_v48 = vpop.permute.xlu1 %363 }
 0x111   : > { %1833 = vmatpush3.bf16.msra.mxu1 %v2257_v35  ;;  %v384_v58 = vsel %vm375_vm4, %v364_v48, %v366_v45 }
 0x112   : > { %1838 = vmatprep.subr.bf16.mxu1 %v2056_v6 }
 0x114   : > { %v372_v49 = vpop.permute.xlu0 %371  ;;  %1835 = vmatmul.mubr.msk.bf16.vlgmr.msra.gmra.mxu1 %vm406_vm3, %v2280_v47  ;;  %v2286_v50 = vpop.permute.xlu1 %501 }
 0x115   : > { %1839 = vmatpush3.bf16.msra.mxu1 %v2266_v41  ;;  %v387_v51 = vsel %vm375_vm4, %v372_v49, %v374_v38  ;;  %1850 = vmatprep.mubr.msk.bf16.mxu1 %vm2057_vm0, %v2056_v6 }
 0x116   : > { %414 = vmatprep.subr.bf16.mxu0 %v387_v51  ;;  %1840 = vmatprep.subr.bf16.mxu1 %v2056_v6 }
 0x118   : > { %v370_v52 = vpop.permute.xlu0 %369  ;;  %v354_v53 = vpop.permute.xlu1 %353 }
 0x119   : > { %1841 = vmatpush3.bf16.msra.mxu1 %v2271_v44  ;;  %v386_v54 = vsel %vm375_vm4, %v370_v52, %v372_v49  ;;  %v381_v63 = vsel %vm375_vm4, %v354_v53, %v356_v42 }
 0x11a   : > { %415 = vmatpush1.bf16.msra.mxu0 %v386_v54  ;;  %1842 = vmatprep.subr.bf16.mxu1 %v2056_v6 }
 0x11b   : > { %416 = vmatprep.subr.bf16.mxu0 %v385_v55 }
 0x11c   : > { %v360_v56 = vpop.permute.xlu0 %359  ;;  %v352_v57 = vpop.permute.xlu1 %351 }
 0x11d   : > { %1843 = vmatpush3.bf16.msra.mxu1 %v2268_v43  ;;  %v383_v59 = vsel %vm375_vm4, %v360_v56, %v362_v40  ;;  %v380_v2 = vsel %vm375_vm4, %v352_v57, %v354_v53  ;;  %v1961_v57 = vld [vmem:[%s2609_s1 + $0x10] sm:$0xff]  }
 0x11e   : > { %417 = vmatpush1.bf16.msra.mxu0 %v384_v58  ;;  %1844 = vmatprep.subr.bf16.mxu1 %v2056_v6 }
 0x11f   : > { %418 = vmatprep.subr.bf16.mxu0 %v383_v59 }
 0x120   : > { %v358_v60 = vpop.permute.xlu0 %357  ;;  %v2301_v61 = vpop.permute.xlu1 %499 }
 0x121   : > { %1845 = vmatpush3.bf16.msra.mxu1 %v2275_v46  ;;  %v382_v62 = vsel %vm375_vm4, %v358_v60, %v360_v56 }
 0x122   : > { %419 = vmatpush1.bf16.msra.mxu0 %v382_v62  ;;  %1846 = vmatprep.subr.bf16.mxu1 %v2056_v6 }
 0x123   : > { %420 = vmatprep.subr.bf16.mxu0 %v381_v63 }
 0x124   : > { %v506_v0 = vpop.permute.xlu0 %505  ;;  %v2307_v1 = vpop.permute.xlu1 %695 }
 0x125   : > { %1847 = vmatpush3.bf16.msra.mxu1 %v2259_v36  ;;  %v538_v32 = vsel %vm535_vm5, %v506_v0, %v2261_v37  ;;  %v536_v36 = vsel %vm535_vm5, %v2301_v61, %v2286_v50 }
 0x126   : > { %421 = vmatpush1.bf16.msra.mxu0 %v380_v2  ;;  %1848 = vmatprep.subr.bf16.mxu1 %v2056_v6 }
 0x127   : > { %422 = vmatprep.subr.bf16.mxu0 %v379_v3 }
 0x128   : > { %v504_v4 = vpop.permute.xlu0 %503  ;;  %v526_v7 = vpop.permute.xlu1 %525 }
 0x129   : > { %1849 = vmatpush3.bf16.msra.mxu1 %v504_v4  ;;  %v545_v17 = vsel %vm535_vm5, %v526_v7, %v2271_v44  ;;  %v537_v34 = vsel %vm535_vm5, %v2286_v50, %v504_v4 }
 0x12a   : > { %423 = vmatpush1.bf16.msra.mxu0 %v378_v8  ;;  %1854 = vmatprep.subr.bf16.mxu1 %v2056_v6 }
 0x12b   : > { %424 = vmatprep.subr.bf16.mxu0 %v377_v9 }
 0x12c   : > { %v532_v10 = vpop.permute.xlu0 %531  ;;  %1851 = vmatmul.mubr.msk.bf16.vlgmr.msra.gmra.mxu1 %vm406_vm3, %v2318_v5  ;;  %v524_v11 = vpop.permute.xlu1 %523 }
 0x12d   : > { %1855 = vmatpush3.bf16.msra.mxu1 %v2307_v1  ;;  %v547_v13 = vsel %vm535_vm5, %v532_v10, %v2266_v41  ;;  %1866 = vmatprep.mubr.msk.bf16.mxu1 %vm2057_vm0, %v2056_v6  ;;  %v544_v19 = vsel %vm535_vm5, %v524_v11, %v526_v7  ;;  %vm1026_vm0 = vcmask 392192  }
 0x12e   : > { %425 = vmatpush1.bf16.msra.mxu0 %v376_v12  ;;  %1856 = vmatprep.subr.bf16.mxu1 %v2056_v6 }
 0x12f   : > { %573 = vmatprep.subr.bf16.mxu0 %v547_v13 }
 0x130   : > { %v530_v14 = vpop.permute.xlu0 %529  ;;  %v514_v16 = vpop.permute.xlu1 %513 }
 0x131   : > { %v546_v15 = vsel %vm535_vm5, %v530_v14, %v532_v10  ;;  %1736 = vmatmul.mubr.msk.bf16.vlgmr.msra.gmra.mxu0 %vm406_vm3, %v2280_v47  ;;  %v541_v25 = vsel %vm535_vm5, %v514_v16, %v2275_v46 }
 0x132   : > { %574 = vmatpush1.bf16.msra.mxu0 %v546_v15  ;;  %601 = vmatprep.mubr.bf16.mxu0 %v2058_v27 }
 0x133   : > { %575 = vmatprep.subr.bf16.mxu0 %v545_v17 }
 0x134   : > { %v520_v18 = vpop.permute.xlu0 %519  ;;  %v512_v20 = vpop.permute.xlu1 %511 }
 0x135   : > { %v543_v21 = vsel %vm535_vm5, %v520_v18, %v2268_v43  ;;  %v540_v28 = vsel %vm535_vm5, %v512_v20, %v514_v16 }
 0x136   : > { %576 = vmatpush1.bf16.msra.mxu0 %v544_v19 }
 0x137   : > { %577 = vmatprep.subr.bf16.mxu0 %v543_v21 }
 0x138   : > { %v518_v22 = vpop.permute.xlu0 %517  ;;  %v684_v24 = vpop.permute.xlu1 %683 }
 0x139   : > { %v542_v23 = vsel %vm535_vm5, %v518_v22, %v520_v18 }
 0x13a   : > { %578 = vmatpush1.bf16.msra.mxu0 %v542_v23 }
 0x13b   : > { %579 = vmatprep.subr.bf16.mxu0 %v541_v25 }
 0x13c   : > { %v690_v26 = vpop.permute.xlu0 %689  ;;  %v688_v29 = vpop.permute.xlu1 %687 }
 0x13d   : > { %1857 = vmatpush3.bf16.msra.mxu1 %v690_v26  ;;  %v707_v41 = vsel %vm697_vm6, %v688_v29, %v690_v26 }
 0x13e   : > { %580 = vmatpush1.bf16.msra.mxu0 %v540_v28  ;;  %1858 = vmatprep.subr.bf16.mxu1 %v2056_v6 }
 0x13f   : > { %581 = vmatprep.subr.bf16.mxu0 %v539_v30 }
 0x140   : > { %v678_v31 = vpop.permute.xlu0 %677  ;;  %v686_v33 = vpop.permute.xlu1 %685 }
 0x141   : > { %1859 = vmatpush3.bf16.msra.mxu1 %v684_v24  ;;  %v706_v44 = vsel %vm697_vm6, %v686_v33, %v688_v29 }
 0x142   : > { %582 = vmatpush1.bf16.msra.mxu0 %v538_v32  ;;  %1860 = vmatprep.subr.bf16.mxu1 %v2056_v6 }
 0x143   : > { %583 = vmatprep.subr.bf16.mxu0 %v537_v34 }
 0x144   : > { %v694_v35 = vpop.permute.xlu0 %693  ;;  %v672_v38 = vpop.permute.xlu1 %671 }
 0x145   : > { %1861 = vmatpush3.bf16.msra.mxu1 %v678_v31  ;;  %v709_v37 = vsel %vm697_vm6, %v694_v35, %v2307_v1 }
 0x146   : > { %584 = vmatpush1.bf16.msra.mxu0 %v536_v36  ;;  %1862 = vmatprep.subr.bf16.mxu1 %v2056_v6 }
 0x147   : > { %735 = vmatprep.subr.bf16.mxu0 %v709_v37 }
 0x148   : > { %v692_v39 = vpop.permute.xlu0 %691  ;;  %v676_v42 = vpop.permute.xlu1 %675 }
 0x149   : > { %v708_v40 = vsel %vm697_vm6, %v692_v39, %v694_v35  ;;  %1739 = vmatmul.mubr.msk.bf16.vlgmr.msra.gmra.mxu0 %vm406_vm3, %v2318_v5  ;;  %1863 = vmatpush3.bf16.msra.mxu1 %v672_v38  ;;  %v703_v49 = vsel %vm697_vm6, %v676_v42, %v678_v31 }
 0x14a   : > { %736 = vmatpush1.bf16.msra.mxu0 %v708_v40  ;;  %1864 = vmatprep.subr.bf16.mxu1 %v2056_v6 }
 0x14b   : > { %737 = vmatprep.subr.bf16.mxu0 %v707_v41  ;;  %763 = vmatprep.mubr.bf16.mxu0 %v2058_v27 }
 0x14c   : > { %v682_v43 = vpop.permute.xlu0 %681  ;;  %v674_v47 = vpop.permute.xlu1 %673 }
 0x14d   : > { %v705_v45 = vsel %vm697_vm6, %v682_v43, %v684_v24  ;;  %v702_v50 = vsel %vm697_vm6, %v674_v47, %v676_v42 }
 0x14e   : > { %738 = vmatpush1.bf16.msra.mxu0 %v706_v44 }
 0x14f   : > { %739 = vmatprep.subr.bf16.mxu0 %v705_v45 }
 0x150   : > { %v680_v46 = vpop.permute.xlu0 %679  ;;  %v664_v51 = vpop.permute.xlu1 %663 }
 0x151   : > { %v704_v48 = vsel %vm697_vm6, %v680_v46, %v682_v43 }
 0x152   : > { %740 = vmatpush1.bf16.msra.mxu0 %v704_v48 }
 0x153   : > { %741 = vmatprep.subr.bf16.mxu0 %v703_v49 }
 0x154   : > { %v670_v6 = vpop.permute.xlu0 %669  ;;  %v662_v55 = vpop.permute.xlu1 %661 }
 0x155   : > { %v701_v52 = vsel %vm697_vm6, %v670_v6, %v672_v38  ;;  %v698_v59 = vsel %vm697_vm6, %v662_v55, %v664_v51 }
 0x156   : > { %742 = vmatpush1.bf16.msra.mxu0 %v702_v50 }
 0x157   : > { %743 = vmatprep.subr.bf16.mxu0 %v701_v52 }
 0x158   : > { %v668_v53 = vpop.permute.xlu0 %667 }
 0x159   : > { %v700_v54 = vsel %vm697_vm6, %v668_v53, %v670_v6 }
 0x15a   : > { %744 = vmatpush1.bf16.msra.mxu0 %v700_v54 }
 0x15c   : > { %v666_v56 = vpop.permute.xlu0 %665 }
 0x15d   : > { %1865 = vmatpush3.bf16.msra.mxu1 %v666_v56  ;;  %v699_v58 = vsel %vm697_vm6, %v664_v51, %v666_v56 }
 0x15e   : > { %745 = vmatprep.subr.bf16.mxu0 %v699_v58 }
 0x15f   : > { %746 = vmatpush1.bf16.msra.mxu0 %v698_v59 }
 0x160   : > { %1867 = vmatmul.mubr.msk.bf16.vlgmr.msra.gmra.mxu1 %vm406_vm3, %v1961_v57 }
 0x161   : > { %v831_v32 = vpop.permute.xlu1 %830 }
 0x162   : > { %1744 = vmatmul.mubr.msk.bf16.vlgmr.msra.gmra.mxu0 %vm406_vm3, %v1961_v57 }
 0x163   : > { %1065 = vmatprep.mubr.bf16.mxu0 %v2058_v27 }
 0x169   : > { %v826_v13 = vpop.permute.xlu0 %825 }
 0x1d4   : > { %v487_v60 = vpop.f32.mrf.mxu1 }
 0x1d6   : > { %v1836_v61 = vpop.f32.mrf.mxu1 }
 0x1d8   : > { %v490_v62 = vpop.f32.mrf.mxu1 }
 0x1da   : > { %v1837_v63 = vpop.f32.mrf.mxu1 }
 0x1ec   : > { %v646_v0 = vpop.f32.mrf.mxu1 }
 0x1ed   : > { %v647_v12 = vadd.f32 %v646_v0, %v487_v60  ;;  %v877_v0 = vlaneseq }
 0x1ee   : > { %v1852_v1 = vpop.f32.mrf.mxu1 }
 0x1f0   : > { %v649_v2 = vpop.f32.mrf.mxu1 }
 0x1f1   : > { %v444_v4 = vpop.f32.mrf.mxu0  ;;  %v650_v20 = vadd.f32 %v649_v2, %v490_v62  ;;  %v878_v2 = vshrl.u32 %v877_v0, 7 }
 0x1f2   : > { %v1853_v3 = vpop.f32.mrf.mxu1 }
 0x1f3   : > { %v446_v5 = vpop.f32.mrf.mxu0  ;;  %v879_v3 = vsub.s32 0, %v878_v2 }
 0x1f5   : > { %v448_v7 = vpop.f32.mrf.mxu0 }
 0x1f7   : > { %v450_v8 = vpop.f32.mrf.mxu0 }
 0x209   : > { %v603_v9 = vpop.f32.mrf.mxu0 }
 0x20a   : > { %v604_v16 = vadd.f32 %v603_v9, %v444_v4  ;;  %v883_v4 = vsub.s32 1, %v878_v2  ;;  %v875_v9 = vld [vmem:[%s2613_s5] sm:$0x7] }
 0x20b   : > { %v605_v10 = vpop.f32.mrf.mxu0 }
 0x20c   : > { %v606_v21 = vadd.f32 %v605_v10, %v446_v5 }
 0x20d   : > { %v607_v11 = vpop.f32.mrf.mxu0 }
 0x20e   : > { %v608_v24 = vadd.f32 %v607_v11, %v448_v7  ;;  %v887_v7 = vsub.s32 2, %v878_v2  ;;  %v880_v11 = vrot.slane %v875_v9, %v879_v3  ;;  %v1566_v3 = vld [vmem:[%s2111_s26 + $0x20] sm:$0xff] }
 0x20f   : > { %v609_v14 = vpop.f32.mrf.mxu0 }
 0x210   : > { %v610_v39 = vadd.f32 %v609_v14, %v450_v8 }
 0x220   : > { %v808_v15 = vpop.f32.mrf.mxu1 }
 0x221   : > { %v817_v17 = vadd.f32 %v808_v15, %v647_v12  ;;  %v884_v12 = vrot.slane %v875_v9, %v883_v4  ;;  %v1457_v4 = vld [vmem:[%s2612_s4 + $0x18] sm:$0xff] }
 0x222   : > { %v765_v18 = vpop.f32.mrf.mxu0  ;;  %v1868_v19 = vpop.f32.mrf.mxu1 }
 0x223   : > { %v2389_v22 = vadd.f32 %v826_v13, %v817_v17  ;;  %v815_v23 = vadd.f32 %v765_v18, %v604_v16  ;;  %v888_v16 = vrot.slane %v875_v9, %v887_v7  ;;  %v1568_v9 = vld [vmem:[%s2111_s26 + $0x30] sm:$0xff] }
 0x224   : > { %v767_v25 = vpop.f32.mrf.mxu0  ;;  %v811_v26 = vpop.f32.mrf.mxu1 }
 0x225   : > { %v841_v28 = vsub.f32 0.0, %v2389_v22  ;;  %v833_v29 = vadd.f32 %v826_v13, %v815_v23  ;;  %v816_v30 = vadd.f32 %v767_v25, %v606_v21  ;;  %v820_v31 = vadd.f32 %v811_v26, %v650_v20 }
 0x226   : > { %v769_v33 = vpop.f32.mrf.mxu0  ;;  %v1869_v34 = vpop.f32.mrf.mxu1 }
 0x227   : > { %v849_v35 = vmul.f32 1.442695, %v841_v28  ;;  %v839_v36 = vsub.f32 0.0, %v833_v29  ;;  %v834_v38 = vadd.f32 %v826_v13, %v816_v30  ;;  %v818_v37 = vadd.f32 %v769_v33, %v608_v24 }
 0x228   : > { %v2392_v40 = vadd.f32 %v831_v32, %v820_v31  ;;  %v771_v41 = vpop.f32.mrf.mxu0 }
 0x229   : > { %1972 = vpow2.f32 %v849_v35  ;;  %v845_v42 = vmul.f32 1.442695, %v839_v36  ;;  %v840_v43 = vsub.f32 0.0, %v834_v38  ;;  %v836_v44 = vadd.f32 %v831_v32, %v818_v37 }
 0x22a   : > { %v844_v45 = vsub.f32 0.0, %v2392_v40  ;;  %v819_v46 = vadd.f32 %v771_v41, %v610_v39 }
 0x22b   : > { %1974 = vpow2.f32 %v845_v42  ;;  %v847_v47 = vmul.f32 1.442695, %v840_v43  ;;  %v842_v48 = vsub.f32 0.0, %v836_v44 }
 0x22c   : > { %v855_v49 = vmul.f32 1.442695, %v844_v45  ;;  %v837_v6 = vadd.f32 %v831_v32, %v819_v46 }
 0x22d   : > { %1976 = vpow2.f32 %v847_v47  ;;  %v851_v50 = vmul.f32 1.442695, %v842_v48 }
 0x22e   : > { %1978 = vpow2.f32 %v855_v49  ;;  %v843_v51 = vsub.f32 0.0, %v837_v6 }
 0x22f   : > { %1980 = vpow2.f32 %v851_v50 }
 0x230   : > { %v853_v52 = vmul.f32 1.442695, %v843_v51 }
 0x232   : > { %1982 = vpow2.f32 %v853_v52 }
 0x236   : > { %v1973_v53 = vpop.eup %1972 }
 0x237   : > { %v859_v54 = vadd.f32 1.0, %v1973_v53 }
 0x238   : > { %v1975_v55 = vpop.eup %1974 }
 0x239   : > { %v857_v56 = vadd.f32 1.0, %v1975_v55  ;;  %1984 = vrcp.f32 %v859_v54  ;;  %v2422_v55 = vld [vmem:[%s2611_s3 + $0x10] sm:$0xff]  }
 0x23a   : > { %v1977_v57 = vpop.eup %1976  ;;  %1876 = vmatprep.mubr.msk.bf16.mxu1 %vm1026_vm0, %v2422_v55 }
 0x23b   : > { %v1979_v58 = vpop.eup %1978  ;;  %1986 = vrcp.f32 %v857_v56  ;;  %v858_v59 = vadd.f32 1.0, %v1977_v57  ;;  %v1454_v57 = vld [vmem:[%s2612_s4] sm:$0xff] }
 0x23c   : > { %v1981_v60 = vpop.eup %1980  ;;  %v862_v61 = vadd.f32 1.0, %v1979_v58  ;;  %v1456_v58 = vld [vmem:[%s2612_s4 + $0x10] sm:$0xff] }
 0x23d   : > { %1988 = vrcp.f32 %v858_v59  ;;  %v860_v62 = vadd.f32 1.0, %v1981_v60  ;;  %v1455_v59 = vld [vmem:[%s2612_s4 + $0x8] sm:$0xff]  ;;  %v1562_v60 = vld [vmem:[%s2111_s26] sm:$0xff] }
 0x23e   : > { %v1571_v0 = vunpack.c.h.bf16 %v1562_v60 }
 0x23f   : > { %v1983_v63 = vpop.eup %1982  ;;  %1990 = vrcp.f32 %v860_v62  ;;  %v1564_v62 = vld [vmem:[%s2111_s26 + $0x10] sm:$0xff] }
 0x240   : > { %1992 = vrcp.f32 %v862_v61  ;;  %v861_v1 = vadd.f32 1.0, %v1983_v63  ;;  %v1563_v61 = vld [vmem:[%s2111_s26 + $0x8] ss:$16 sps:$4 sm:$0xff]   ;;  %v1570_v63 = vunpack.c.l.bf16 %v1562_v60  ;;  %v1573_v2 = vunpack.c.l.bf16 %v1564_v62 }
 0x241   : > { %v1575_v7 = vunpack.c.h.bf16 %v1563_v61 }
 0x242   : > { %1994 = vrcp.f32 %v861_v1  ;;  %v1572_v1 = vunpack.c.l.bf16 %v1563_v61 }
 0x246   : > { %v1985_v5 = vpop.eup %1984 }
 0x247   : > { %v871_v14 = vmul.f32 %v1985_v5, %v2389_v22  ;;  %v1574_v5 = vunpack.c.h.bf16 %v1564_v62 }
 0x248   : > { %v1987_v8 = vpop.eup %1986 }
 0x249   : > { %v869_v10 = vmul.f32 %v1987_v8, %v833_v29  ;;  %v894_v25 = vmul.f32 %v888_v16, %v871_v14  ;;  %v1567_v8 = vld [vmem:[%s2111_s26 + $0x28] ss:$16 sps:$4 sm:$0xff]   ;;  %v1931_v14 = vpack.i.bf16 %v1575_v7, %v1574_v5  ;;  %v1970_v7 = vld [vmem:[%s2611_s3 + $0x20] sm:$0xff]  }
 0x24a   : > { %v1989_v13 = vpop.eup %1988 }
 0x24b   : > { %v870_v15 = vmul.f32 %v1989_v13, %v834_v38  ;;  %v892_v19 = vmul.f32 %v880_v11, %v869_v10  ;;  %v1783_v31 = vpack.c.bf16 %v894_v25, %v894_v25  ;;  %v1921_v10 = vpack.i.bf16 %v1571_v0, %v1570_v63 }
 0x24c   : > { %v1991_v17 = vpop.eup %1990  ;;  %v1926_v13 = vpack.i.bf16 %v1573_v2, %v1572_v1 }
 0x24d   : > { %v1993_v18 = vpop.eup %1992  ;;  %v893_v20 = vmul.f32 %v884_v12, %v870_v15  ;;  %v872_v21 = vmul.f32 %v1991_v17, %v836_v44  ;;  %v1578_v15 = vunpack.c.l.bf16 %v1567_v8 }
 0x24e   : > { %v874_v26 = vmul.f32 %v1993_v18, %v2392_v40 }
 0x24f   : > { %v1995_v23 = vpop.eup %1994  ;;  %v1782_v24 = vpack.c.bf16 %v893_v20, %v892_v19  ;;  %v895_v29 = vmul.f32 %v880_v11, %v872_v21  ;;  %v1576_v11 = vunpack.c.l.bf16 %v1566_v3  ;;  %v1580_v19 = vunpack.c.h.bf16 %v1568_v9 }
 0x250   : > { %v873_v28 = vmul.f32 %v1995_v23, %v837_v6  ;;  %v897_v22 = vmul.f32 %v888_v16, %v874_v26  ;;  %v1579_v16 = vunpack.c.l.bf16 %v1568_v9  ;;  %v1581_v20 = vunpack.c.h.bf16 %v1567_v8  ;;  %v1971_v8 = vld [vmem:[%s2611_s3 + $0x28] sm:$0xff]  }
 0x251   : > { %914 = vrot.lane.b32.xlu1 %v1782_v24, %s2060_s20 }
 0x252   : > { %v896_v30 = vmul.f32 %v884_v12, %v873_v28  ;;  %v1785_v33 = vpack.c.bf16 %v897_v22, %v897_v22  ;;  %v1577_v12 = vunpack.c.h.bf16 %v1566_v3  ;;  %v1941_v18 = vpack.i.bf16 %v1579_v16, %v1578_v15  ;;  %v1967_v22 = vld [vmem:[%s2611_s3 + $0x18] sm:$0xff]  }
 0x253   : > { %v1946_v21 = vpack.i.bf16 %v1581_v20, %v1580_v19 }
 0x254   : > { %v1784_v32 = vpack.c.bf16 %v896_v30, %v895_v29  ;;  %v1936_v17 = vpack.i.bf16 %v1577_v12, %v1576_v11 }
 0x255   : > { %916 = vrot.lane.b32.xlu1 %v1783_v31, %s2060_s20 }
 0x256   : > { %918 = vrot.lane.b32.xlu0 %v1784_v32, %s2060_s20 }
 0x25a   : > { %920 = vrot.lane.b32.xlu0 %v1785_v33, %s2060_s20  ;;  %s1900_s20 = smul.u32 96, %s2616_s22 }
 0x25c   : > { %s2568_s24 = scalar_lea.vmem %s2614_s6, %s1900_s20 }
 0x2c3   : > { %v915_v34 = vpop.permute.xlu1 %914 }
 0x2c4   : > { %v922_v35 = vrot.slane %v915_v34, 4 }
 0x2c6   : > { %v925_v36 = vsel %vm924_vm13, %v922_v35, %v915_v34 }
 0x2c7   : > { %936 = vst.msk [vmem:[#allocation2] sm:$0xff] %vm935_vm14, %v925_v36  ;;  %v917_v38 = vpop.permute.xlu1 %916 }
 0x2c8   : > { %v919_v37 = vpop.permute.xlu0 %918  ;;  %v926_v39 = vsel %vm924_vm13, %v922_v35, %v917_v38 }
 0x2c9   : > { %v923_v40 = vrot.slane %v919_v37, 4  ;;  %938 = vst.msk [vmem:[#allocation2 + $0x8] sm:$0xf] %vm937_vm15, %v926_v39 }
 0x2cb   : > { %v927_v41 = vsel %vm924_vm13, %v923_v40, %v919_v37 }
 0x2cc   : > { %939 = vst.msk [vmem:[#allocation2 + $0x10] sm:$0xff] %vm935_vm14, %v927_v41  ;;  %v921_v42 = vpop.permute.xlu0 %920 }
 0x2cd   : > { %v928_v43 = vsel %vm924_vm13, %v923_v40, %v921_v42 }
 0x2ce   : > { %940 = vst.msk [vmem:[#allocation2 + $0x18] sm:$0xf] %vm937_vm15, %v928_v43 }
 0x2d3   : > { %v1962_v44 = vld [vmem:[#allocation2 + $0x4] ss:$16 sps:$4 sm:$0xff]   ;;  %v1965_v46 = vld [vmem:[#allocation2] ss:$16 sps:$4 sm:$0xff]  }
 0x2d4   : > { %968 = vrot.lane.b32.xlu1 %v1962_v44, %s2052_s27 }
 0x2d5   : > { %v1964_v45 = vld [vmem:[#allocation2 + $0x8] ss:$16 sps:$4 sm:$0xff]  }
 0x2d6   : > { %970 = vrot.lane.b32.xlu0 %v1964_v45, %s2052_s27 }
 0x2d8   : > { %966 = vrot.lane.b32.xlu1 %v1965_v46, %s2052_s27 }
 0x2da   : > { %960 = vrot.lane.b32.xlu0 %v1962_v44, %s2053_s28 }
 0x2dc   : > { %962 = vrot.lane.b32.xlu1 %v1964_v45, %s2053_s28 }
 0x2de   : > { %958 = vrot.lane.b32.xlu0 %v1965_v46, %s2053_s28 }
 0x2e0   : > { %995 = vrot.lane.b32.xlu1 %v1962_v44, %s2054_s29 }
 0x2e2   : > { %997 = vrot.lane.b32.xlu0 %v1964_v45, %s2054_s29 }
 0x2e4   : > { %993 = vrot.lane.b32.xlu1 %v1965_v46, %s2054_s29 }
 0x346   : > { %v969_v47 = vpop.permute.xlu1 %968 }
 0x348   : > { %v971_v48 = vpop.permute.xlu0 %970 }
 0x349   : > { %1009 = vrot.lane.b32.xlu0 %v971_v48, %s2054_s29  ;;  %v973_v53 = vsel %vm324_vm1, %v969_v47, %v971_v48 }
 0x34a   : > { %v967_v49 = vpop.permute.xlu1 %966 }
 0x34b   : > { %v972_v56 = vsel %vm324_vm1, %v967_v49, %v969_v47  ;;  %vm1618_vm1 = vcmask 752640  }
 0x34c   : > { %v961_v6 = vpop.permute.xlu0 %960 }
 0x34d   : > { %1161 = vrot.lane.b32.xlu0 %v971_v48, %s2055_s30 }
 0x34e   : > { %v963_v50 = vpop.permute.xlu1 %962 }
 0x34f   : > { %1003 = vrot.lane.b32.xlu1 %v963_v50, %s2054_s29  ;;  %v965_v51 = vsel %vm307_vm2, %v961_v6, %v963_v50 }
 0x350   : > { %v959_v52 = vpop.permute.xlu0 %958 }
 0x351   : > { %1001 = vrot.lane.b32.xlu0 %v965_v51, %s2054_s29  ;;  %v964_v54 = vsel %vm307_vm2, %v959_v52, %v961_v6  ;;  %vm1653_vm2 = vcmask 556032  }
 0x352   : > { %v996_v23 = vpop.permute.xlu1 %995 }
 0x353   : > { %1007 = vrot.lane.b32.xlu1 %v973_v53, %s2054_s29 }
 0x354   : > { %v998_v24 = vpop.permute.xlu0 %997 }
 0x355   : > { %999 = vrot.lane.b32.xlu0 %v964_v54, %s2054_s29  ;;  %v1012_v41 = vsel %vm375_vm4, %v996_v23, %v998_v24 }
 0x356   : > { %v994_v26 = vpop.permute.xlu1 %993 }
 0x357   : > { %1005 = vrot.lane.b32.xlu1 %v972_v56, %s2054_s29  ;;  %v1011_v43 = vsel %vm375_vm4, %v994_v26, %v996_v23 }
 0x359   : > { %1155 = vrot.lane.b32.xlu0 %v963_v50, %s2055_s30 }
 0x35b   : > { %1149 = vrot.lane.b32.xlu1 %v1964_v45, %s2055_s30 }
 0x35d   : > { %1145 = vrot.lane.b32.xlu0 %v1965_v46, %s2055_s30 }
 0x35f   : > { %1147 = vrot.lane.b32.xlu1 %v1962_v44, %s2055_s30 }
 0x361   : > { %1153 = vrot.lane.b32.xlu0 %v965_v51, %s2055_s30 }
 0x363   : > { %1317 = vrot.lane.b32.xlu1 %v971_v48, %s2059_s7 }
 0x365   : > { %1151 = vrot.lane.b32.xlu0 %v964_v54, %s2055_s30 }
 0x367   : > { %1159 = vrot.lane.b32.xlu1 %v973_v53, %s2055_s30 }
 0x369   : > { %1315 = vrot.lane.b32.xlu0 %v973_v53, %s2059_s7 }
 0x36b   : > { %1157 = vrot.lane.b32.xlu1 %v972_v56, %s2055_s30 }
 0x36d   : > { %1309 = vrot.lane.b32.xlu0 %v965_v51, %s2059_s7 }
 0x36f   : > { %1311 = vrot.lane.b32.xlu1 %v963_v50, %s2059_s7  ;;  %v1968_v50 = vld [vmem:[%s2611_s3] sm:$0xff]  }
 0x371   : > { %1307 = vrot.lane.b32.xlu0 %v964_v54, %s2059_s7 }
 0x373   : > { %1313 = vrot.lane.b32.xlu1 %v972_v56, %s2059_s7 }
 0x375   : > { %1305 = vrot.lane.b32.xlu0 %v1964_v45, %s2059_s7 }
 0x377   : > { %1303 = vrot.lane.b32.xlu1 %v1962_v44, %s2059_s7 }
 0x379   : > { %1460 = vperm.xlu0 %1919, %v1454_v57   ;;  %v1969_v57 = vld [vmem:[%s2611_s3 + $0x8] sm:$0xff]  }
 0x37b   : > { %1301 = vrot.lane.b32.xlu1 %v1965_v46, %s2059_s7  ;;  %s2061_s7 = smov 92  }
 0x37d   : > { %1470 = vperm.xlu0 %1919, %v1456_v58  }
 0x37f   : > { %1465 = vperm.xlu1 %1920, %v1455_v59  }
 0x381   : > { %1922 = vrot.lane.b32.xlu0 %v1921_v10, %s2061_s7 }
 0x383   : > { %1475 = vperm.xlu1 %1920, %v1457_v4  }
 0x385   : > { %1932 = vrot.lane.b32.xlu0 %v1931_v14, %s2061_s7 }
 0x387   : > { %1927 = vrot.lane.b32.xlu1 %v1926_v13, %s2061_s7 }
 0x389   : > { %1942 = vrot.lane.b32.xlu0 %v1941_v18, %s2061_s7 }
 0x38b   : > { %1937 = vrot.lane.b32.xlu1 %v1936_v17, %s2061_s7 }
 0x38f   : > { %1947 = vrot.lane.b32.xlu1 %v1946_v21, %s2061_s7 }
 0x3bb   : > { %v1010_v25 = vpop.permute.xlu0 %1009 }
 0x3bc   : > { %1870 = vmatprep.subr.bf16.mxu1 %v1010_v25 }
 0x3bd   : > { %1871 = vmatpush3.bf16.msra.mxu1 %v1010_v25 }
 0x3bf   : > { %v1162_v28 = vpop.permute.xlu0 %1161 }
 0x3c1   : > { %v1004_v29 = vpop.permute.xlu1 %1003 }
 0x3c2   : > { %1872 = vmatprep.subr.bf16.mxu1 %v1004_v29 }
 0x3c3   : > { %v1002_v30 = vpop.permute.xlu0 %1001  ;;  %1873 = vmatpush3.bf16.msra.mxu1 %v1004_v29 }
 0x3c4   : > { %1874 = vmatprep.subr.bf16.mxu1 %v998_v24  ;;  %v1014_v38 = vsel %vm375_vm4, %v1002_v30, %v1004_v29 }
 0x3c5   : > { %v1008_v31 = vpop.permute.xlu1 %1007 }
 0x3c6   : > { %v1016_v32 = vsel %vm375_vm4, %v1008_v31, %v1010_v25 }
 0x3c7   : > { %v1000_v33 = vpop.permute.xlu0 %999  ;;  %1043 = vmatprep.subr.bf16.mxu0 %v1016_v32  ;;  %1875 = vmatpush3.bf16.msra.mxu1 %v998_v24 }
 0x3c8   : > { %v1013_v39 = vsel %vm375_vm4, %v1000_v33, %v1002_v30 }
 0x3c9   : > { %v1006_v34 = vpop.permute.xlu1 %1005 }
 0x3ca   : > { %v1015_v35 = vsel %vm375_vm4, %v1006_v34, %v1008_v31  ;;  %1877 = vmatmul.mubr.msk.bf16.vlgmr.msra.gmra.mxu1 %vm1026_vm0, %v1967_v22 }
 0x3cb   : > { %v1156_v36 = vpop.permute.xlu0 %1155  ;;  %1044 = vmatpush1.bf16.msra.mxu0 %v1015_v35  ;;  %1216 = vmatprep.mubr.bf16.mxu1 %v2058_v27 }
 0x3cc   : > { %1045 = vmatprep.subr.bf16.mxu0 %v1014_v38 }
 0x3cd   : > { %v1150_v37 = vpop.permute.xlu1 %1149 }
 0x3cf   : > { %v1146_v40 = vpop.permute.xlu0 %1145  ;;  %1046 = vmatpush1.bf16.msra.mxu0 %v1013_v39 }
 0x3d0   : > { %1047 = vmatprep.subr.bf16.mxu0 %v1012_v41 }
 0x3d1   : > { %v1148_v42 = vpop.permute.xlu1 %1147 }
 0x3d2   : > { %v1164_v59 = vsel %vm535_vm5, %v1148_v42, %v1150_v37  ;;  %v1163_v61 = vsel %vm535_vm5, %v1146_v40, %v1148_v42 }
 0x3d3   : > { %v1154_v44 = vpop.permute.xlu0 %1153  ;;  %1048 = vmatpush1.bf16.msra.mxu0 %v1011_v43 }
 0x3d4   : > { %1880 = vmatprep.subr.bf16.mxu0 %v1162_v28  ;;  %v1166_v53 = vsel %vm535_vm5, %v1154_v44, %v1156_v36 }
 0x3d5   : > { %v1318_v45 = vpop.permute.xlu1 %1317 }
 0x3d6   : > { %1759 = vmatmul.mubr.msk.bf16.vlgmr.msra.gmra.mxu0 %vm1026_vm0, %v2422_v55 }
 0x3d7   : > { %v1152_v46 = vpop.permute.xlu0 %1151  ;;  %1881 = vmatpush3.bf16.msra.mxu0 %v1162_v28  ;;  %1075 = vmatprep.mubr.bf16.mxu0 %v2058_v27 }
 0x3d8   : > { %1882 = vmatprep.subr.bf16.mxu0 %v1156_v36  ;;  %v1165_v56 = vsel %vm535_vm5, %v1152_v46, %v1154_v44 }
 0x3d9   : > { %v1160_v47 = vpop.permute.xlu1 %1159 }
 0x3da   : > { %v1168_v48 = vsel %vm535_vm5, %v1160_v47, %v1162_v28 }
 0x3db   : > { %v1316_v49 = vpop.permute.xlu0 %1315  ;;  %1194 = vmatprep.subr.bf16.mxu1 %v1168_v48  ;;  %1883 = vmatpush3.bf16.msra.mxu0 %v1156_v36 }
 0x3dc   : > { %1884 = vmatprep.subr.bf16.mxu0 %v1150_v37  ;;  %v1324_v54 = vsel %vm697_vm6, %v1316_v49, %v1318_v45 }
 0x3dd   : > { %v1158_v6 = vpop.permute.xlu1 %1157 }
 0x3de   : > { %v1167_v51 = vsel %vm535_vm5, %v1158_v6, %v1160_v47  ;;  %1760 = vmatmul.mubr.msk.bf16.gmra.mxu0 %vm1026_vm0, %v1967_v22 }
 0x3df   : > { %v1310_v52 = vpop.permute.xlu0 %1309  ;;  %1195 = vmatpush1.bf16.msra.mxu1 %v1167_v51  ;;  %1885 = vmatpush3.bf16.msra.mxu0 %v1150_v37 }
 0x3e0   : > { %1196 = vmatprep.subr.bf16.mxu1 %v1166_v53  ;;  %1350 = vmatprep.subr.bf16.mxu0 %v1324_v54 }
 0x3e1   : > { %v1312_v55 = vpop.permute.xlu1 %1311  ;;  %1886 = vmatprep.mubr.msk.bf16.mxu0 %vm1026_vm0, %v1968_v50 }
 0x3e2   : > { %v1322_v63 = vsel %vm697_vm6, %v1310_v52, %v1312_v55 }
 0x3e3   : > { %v1308_v58 = vpop.permute.xlu0 %1307  ;;  %1197 = vmatpush1.bf16.msra.mxu1 %v1165_v56 }
 0x3e4   : > { %1198 = vmatprep.subr.bf16.mxu1 %v1164_v59  ;;  %v1321_v2 = vsel %vm697_vm6, %v1308_v58, %v1310_v52 }
 0x3e5   : > { %v1314_v60 = vpop.permute.xlu1 %1313 }
 0x3e6   : > { %v1323_v62 = vsel %vm697_vm6, %v1314_v60, %v1316_v49  ;;  %1887 = vmatmul.mubr.msk.bf16.vlgmr.msra.gmra.mxu0 %vm1026_vm0, %v1969_v57 }
 0x3e7   : > { %1199 = vmatpush1.bf16.msra.mxu1 %v1163_v61  ;;  %1351 = vmatpush1.bf16.msra.mxu0 %v1323_v62  ;;  %v1306_v0 = vpop.permute.xlu0 %1305 }
 0x3e8   : > { %1352 = vmatprep.subr.bf16.mxu0 %v1322_v63  ;;  %1890 = vmatprep.subr.bf16.mxu1 %v1318_v45 }
 0x3e9   : > { %v1304_v1 = vpop.permute.xlu1 %1303  ;;  %1372 = vmatprep.mubr.bf16.mxu0 %v2058_v27 }
 0x3ea   : > { %1765 = vmatmul.mubr.msk.bf16.vlgmr.msra.gmra.mxu1 %vm1026_vm0, %v1968_v50  ;;  %v1320_v3 = vsel %vm697_vm6, %v1304_v1, %v1306_v0 }
 0x3eb   : > { %1353 = vmatpush1.bf16.msra.mxu0 %v1321_v2  ;;  %1891 = vmatpush3.bf16.msra.mxu1 %v1318_v45 }
 0x3ec   : > { %1354 = vmatprep.subr.bf16.mxu0 %v1320_v3  ;;  %1892 = vmatprep.subr.bf16.mxu1 %v1312_v55 }
 0x3ed   : > { %v1302_v4 = vpop.permute.xlu1 %1301  ;;  %1226 = vmatprep.mubr.bf16.mxu1 %v2058_v27 }
 0x3ee   : > { %v1319_v5 = vsel %vm697_vm6, %v1302_v4, %v1304_v1 }
 0x3ef   : > { %1355 = vmatpush1.bf16.msra.mxu0 %v1319_v5  ;;  %1893 = vmatpush3.bf16.msra.mxu1 %v1312_v55 }
 0x3f0   : > { %1894 = vmatprep.subr.bf16.mxu1 %v1306_v0 }
 0x3f2   : > { %1766 = vmatmul.mubr.msk.bf16.gmra.mxu1 %vm1026_vm0, %v1969_v57  ;;  %1775 = vmatmul.mubr.msk.bf16.vlgmr.msra.gmra.mxu0 %vm1026_vm0, %v1970_v7 }
 0x3f3   : > { %1895 = vmatpush3.bf16.msra.mxu1 %v1306_v0  ;;  %1382 = vmatprep.mubr.bf16.mxu0 %v2058_v27 }
 0x3f4   : > { %1896 = vmatprep.mubr.msk.bf16.mxu1 %vm1026_vm0, %v1970_v7  ;;  %v1461_v22 = vpop.permute.xlu0 %1460 }
 0x3f8   : > { %v1471_v59 = vpop.permute.xlu0 %1470 }
 0x3fa   : > { %1776 = vmatmul.mubr.msk.bf16.gmra.mxu0 %vm1026_vm0, %v1971_v8  ;;  %1897 = vmatmul.mubr.msk.bf16.vlgmr.msra.gmra.mxu1 %vm1026_vm0, %v1971_v8  ;;  %v2516_v42 = vpop.permute.xlu1 %1465 }
 0x48a   : > { %v1878_v12 = vpop.f32.mrf.mxu1 }
 0x48c   : > { %v1120_v15 = vpop.f32.mrf.mxu1 }
 0x48e   : > { %v1879_v27 = vpop.f32.mrf.mxu1 }
 0x490   : > { %v1123_v20 = vpop.f32.mrf.mxu1 }
 0x496   : > { %v1067_v9 = vpop.f32.mrf.mxu0 }
 0x498   : > { %v1069_v10 = vpop.f32.mrf.mxu0 }
 0x49a   : > { %v1071_v11 = vpop.f32.mrf.mxu0 }
 0x49c   : > { %v1073_v13 = vpop.f32.mrf.mxu0 }
 0x49e   : > { %v1077_v14 = vpop.f32.mrf.mxu0 }
 0x4a0   : > { %v1079_v16 = vpop.f32.mrf.mxu0 }
 0x4a2   : > { %v1081_v17 = vpop.f32.mrf.mxu0 }
 0x4a4   : > { %v1083_v18 = vpop.f32.mrf.mxu0 }
 0x4a6   : > { %v1888_v19 = vpop.f32.mrf.mxu0 }
 0x4a7   : > { %v1280_v46 = vadd.f32 %v1888_v19, %v1878_v12 }
 0x4a8   : > { %v1271_v21 = vpop.f32.mrf.mxu0 }
 0x4a9   : > { %v1272_v53 = vadd.f32 %v1271_v21, %v1120_v15 }
 0x4aa   : > { %v1218_v23 = vpop.f32.mrf.mxu1  ;;  %v1889_v24 = vpop.f32.mrf.mxu0 }
 0x4ab   : > { %v1219_v30 = vadd.f32 %v1218_v23, %v1067_v9  ;;  %v1283_v54 = vadd.f32 %v1889_v24, %v1879_v27  ;;  %v1476_v27 = vpop.permute.xlu1 %1475 }
 0x4ac   : > { %v1220_v25 = vpop.f32.mrf.mxu1  ;;  %v1274_v28 = vpop.f32.mrf.mxu0 }
 0x4ad   : > { %v1221_v33 = vadd.f32 %v1220_v25, %v1069_v10  ;;  %v1275_v63 = vadd.f32 %v1274_v28, %v1123_v20 }
 0x4ae   : > { %v1222_v26 = vpop.f32.mrf.mxu1 }
 0x4af   : > { %v1223_v38 = vadd.f32 %v1222_v26, %v1071_v11 }
 0x4b0   : > { %v1224_v29 = vpop.f32.mrf.mxu1 }
 0x4b1   : > { %v1225_v47 = vadd.f32 %v1224_v29, %v1073_v13 }
 0x4b2   : > { %v1228_v31 = vpop.f32.mrf.mxu1  ;;  %v1374_v32 = vpop.f32.mrf.mxu0 }
 0x4b3   : > { %v1442_v34 = vadd.f32 %v1374_v32, %v1219_v30  ;;  %v1229_v6 = vadd.f32 %v1228_v31, %v1077_v14 }
 0x4b4   : > { %v1230_v35 = vpop.f32.mrf.mxu1  ;;  %v1376_v36 = vpop.f32.mrf.mxu0 }
 0x4b5   : > { %v2514_v37 = vadd.f32 %v1461_v22, %v1442_v34  ;;  %v1443_v39 = vadd.f32 %v1376_v36, %v1221_v33  ;;  %v1231_v55 = vadd.f32 %v1230_v35, %v1079_v16 }
 0x4b6   : > { %v1232_v40 = vpop.f32.mrf.mxu1  ;;  %v1378_v41 = vpop.f32.mrf.mxu0 }
 0x4b7   : > { %v1490_v43 = vsub.f32 0.0, %v2514_v37  ;;  %v2519_v44 = vadd.f32 %v1461_v22, %v1443_v39  ;;  %v1445_v45 = vadd.f32 %v1378_v41, %v1223_v38  ;;  %v1233_v0 = vadd.f32 %v1232_v40, %v1081_v17 }
 0x4b8   : > { %v1234_v48 = vpop.f32.mrf.mxu1  ;;  %v1380_v49 = vpop.f32.mrf.mxu0 }
 0x4b9   : > { %v1502_v50 = vmul.f32 1.442695, %v1490_v43  ;;  %v1491_v51 = vsub.f32 0.0, %v2519_v44  ;;  %v2523_v52 = vadd.f32 %v2516_v42, %v1445_v45  ;;  %v1446_v56 = vadd.f32 %v1380_v49, %v1225_v47 }
 0x4ba   : > { %v1384_v57 = vpop.f32.mrf.mxu0  ;;  %v1898_v58 = vpop.f32.mrf.mxu1  ;;  %v1235_v9 = vadd.f32 %v1234_v48, %v1083_v18 }
 0x4bb   : > { %1996 = vpow2.f32 %v1502_v50  ;;  %v1504_v60 = vmul.f32 1.442695, %v1491_v51  ;;  %v1493_v61 = vsub.f32 0.0, %v2523_v52  ;;  %v1448_v62 = vadd.f32 %v1384_v57, %v1229_v6 }
 0x4bc   : > { %v2527_v1 = vadd.f32 %v2516_v42, %v1446_v56  ;;  %v1450_v2 = vadd.f32 %v1898_v58, %v1280_v46  ;;  %v1386_v3 = vpop.f32.mrf.mxu0  ;;  %v1427_v4 = vpop.f32.mrf.mxu1 }
 0x4bd   : > { %1998 = vpow2.f32 %v1504_v60  ;;  %v1508_v5 = vmul.f32 1.442695, %v1493_v61  ;;  %v2529_v7 = vadd.f32 %v1471_v59, %v1448_v62  ;;  %v1449_v8 = vadd.f32 %v1386_v3, %v1231_v55 }
 0x4be   : > { %v1494_v10 = vsub.f32 0.0, %v2527_v1  ;;  %v2532_v11 = vadd.f32 %v1471_v59, %v1450_v2  ;;  %v1444_v12 = vadd.f32 %v1427_v4, %v1272_v53  ;;  %v1388_v13 = vpop.f32.mrf.mxu0  ;;  %v1899_v14 = vpop.f32.mrf.mxu1 }
 0x4bf   : > { %2000 = vpow2.f32 %v1508_v5  ;;  %v1496_v15 = vsub.f32 0.0, %v2529_v7  ;;  %v2535_v16 = vadd.f32 %v1471_v59, %v1449_v8  ;;  %v1451_v17 = vadd.f32 %v1388_v13, %v1233_v0 }
 0x4c0   : > { %v1510_v19 = vmul.f32 1.442695, %v1494_v10  ;;  %v1498_v20 = vsub.f32 0.0, %v2532_v11  ;;  %v2538_v21 = vadd.f32 %v1461_v22, %v1444_v12  ;;  %v1453_v18 = vadd.f32 %v1899_v14, %v1283_v54  ;;  %v1390_v23 = vpop.f32.mrf.mxu0  ;;  %v1430_v29 = vpop.f32.mrf.mxu1 }
 0x4c1   : > { %v1514_v24 = vmul.f32 1.442695, %v1496_v15  ;;  %v1497_v25 = vsub.f32 0.0, %v2535_v16  ;;  %v2541_v26 = vadd.f32 %v1476_v27, %v1451_v17  ;;  %v1452_v28 = vadd.f32 %v1390_v23, %v1235_v9 }
 0x4c2   : > { %2002 = vpow2.f32 %v1510_v19  ;;  %v1518_v30 = vmul.f32 1.442695, %v1498_v20  ;;  %v1492_v31 = vsub.f32 0.0, %v2538_v21  ;;  %v2544_v32 = vadd.f32 %v1476_v27, %v1453_v18 }
 0x4c3   : > { %2004 = vpow2.f32 %v1514_v24  ;;  %v1516_v33 = vmul.f32 1.442695, %v1497_v25  ;;  %v1499_v22 = vsub.f32 0.0, %v2541_v26  ;;  %v2547_v34 = vadd.f32 %v1476_v27, %v1452_v28 }
 0x4c4   : > { %2006 = vpow2.f32 %v1518_v30  ;;  %v1506_v35 = vmul.f32 1.442695, %v1492_v31  ;;  %v1501_v36 = vsub.f32 0.0, %v2544_v32  ;;  %v1447_v38 = vadd.f32 %v1430_v29, %v1275_v63  ;;  %v2555_v63 = vpop.permute.xlu1 %1927 }
 0x4c5   : > { %2008 = vpow2.f32 %v1516_v33  ;;  %v1520_v39 = vmul.f32 1.442695, %v1499_v22  ;;  %v1500_v40 = vsub.f32 0.0, %v2547_v34  ;;  %v1929_v13 = vunpack.i.l.bf16 %v2555_v63 }
 0x4c6   : > { %2010 = vpow2.f32 %v1506_v35  ;;  %v1524_v41 = vmul.f32 1.442695, %v1501_v36  ;;  %v2552_v43 = vadd.f32 %v2516_v42, %v1447_v38  ;;  %v1923_v42 = vpop.permute.xlu0 %1922  ;;  %v1930_v19 = vunpack.i.h.bf16 %v2555_v63 }
 0x4c7   : > { %2012 = vpow2.f32 %v1520_v39  ;;  %v1522_v45 = vmul.f32 1.442695, %v1500_v40  ;;  %v1925_v3 = vunpack.i.h.bf16 %v1923_v42  ;;  %v1924_v4 = vunpack.i.l.bf16 %v1923_v42 }
 0x4c8   : > { %v1997_v46 = vpop.eup %1996  ;;  %2014 = vpow2.f32 %v1524_v41  ;;  %v1495_v47 = vsub.f32 0.0, %v2552_v43  ;;  %v1938_v15 = vpop.permute.xlu1 %1937 }
 0x4c9   : > { %v1526_v48 = vadd.f32 1.0, %v1997_v46  ;;  %2016 = vpow2.f32 %v1522_v45  ;;  %v1619_v27 = vsel %vm1618_vm1, %v1924_v4, %v1925_v3  ;;  %v1620_v28 = vsel %vm1618_vm1, %v1925_v3, %v1929_v13 }
 0x4ca   : > { %v1999_v49 = vpop.eup %1998  ;;  %v1512_v6 = vmul.f32 1.442695, %v1495_v47  ;;  %v2557_v9 = vpop.permute.xlu0 %1932  ;;  %v1940_v35 = vunpack.i.h.bf16 %v1938_v15  ;;  %v1939_v36 = vunpack.i.l.bf16 %v1938_v15 }
 0x4cb   : > { %2018 = vrcp.f32 %v1526_v48  ;;  %v1527_v50 = vadd.f32 1.0, %v1999_v49  ;;  %v1934_v20 = vunpack.i.l.bf16 %v2557_v9  ;;  %v1935_v31 = vunpack.i.h.bf16 %v2557_v9 }
 0x4cc   : > { %v2001_v51 = vpop.eup %2000  ;;  %2020 = vpow2.f32 %v1512_v6  ;;  %v1948_v40 = vpop.permute.xlu1 %1947  ;;  %v1623_v49 = vsel %vm1618_vm1, %v1939_v36, %v1940_v35 }
 0x4cd   : > { %2022 = vrcp.f32 %v1527_v50  ;;  %v1529_v53 = vadd.f32 1.0, %v2001_v51  ;;  %v1949_v50 = vunpack.i.l.bf16 %v1948_v40 }
 0x4ce   : > { %v1943_v33 = vpop.permute.xlu0 %1942 }
 0x4cf   : > { %v2003_v54 = vpop.eup %2002  ;;  %2024 = vrcp.f32 %v1529_v53  ;;  %v1944_v41 = vunpack.i.l.bf16 %v1943_v33  ;;  %v1945_v6 = vunpack.i.h.bf16 %v1943_v33 }
 0x4d0   : > { %v2005_v55 = vpop.eup %2004  ;;  %v1530_v56 = vadd.f32 1.0, %v2003_v54 }
 0x4d1   : > { %v2007_v57 = vpop.eup %2006  ;;  %v1532_v58 = vadd.f32 1.0, %v2005_v55  ;;  %v1624_v55 = vsel %vm1618_vm1, %v1940_v35, %v1944_v41 }
 0x4d2   : > { %v2009_v59 = vpop.eup %2008  ;;  %2026 = vrcp.f32 %v1530_v56  ;;  %v1534_v60 = vadd.f32 1.0, %v2007_v57  ;;  %v1950_v56 = vunpack.i.h.bf16 %v1948_v40 }
 0x4d3   : > { %v2011_v61 = vpop.eup %2010  ;;  %2028 = vrcp.f32 %v1532_v58  ;;  %v1533_v62 = vadd.f32 1.0, %v2009_v59 }
 0x4d4   : > { %v2013_v0 = vpop.eup %2012  ;;  %2030 = vrcp.f32 %v1534_v60  ;;  %v1528_v2 = vadd.f32 1.0, %v2011_v61  ;;  %v1625_v61 = vsel %vm1618_vm1, %v1945_v6, %v1949_v50 }
 0x4d5   : > { %v2015_v5 = vpop.eup %2014  ;;  %2032 = vrcp.f32 %v1533_v62  ;;  %v1535_v8 = vadd.f32 1.0, %v2013_v0 }
 0x4d6   : > { %v2017_v10 = vpop.eup %2016  ;;  %2034 = vrcp.f32 %v1528_v2  ;;  %v1537_v12 = vadd.f32 1.0, %v2015_v5  ;;  %v1626_v2 = vsel %vm1618_vm1, %v1949_v50, %v1950_v56 }
 0x4d7   : > { %2036 = vrcp.f32 %v1535_v8  ;;  %v1536_v14 = vadd.f32 1.0, %v2017_v10 }
 0x4d8   : > { %v2019_v17 = vpop.eup %2018  ;;  %2038 = vrcp.f32 %v1537_v12 }
 0x4d9   : > { %v2021_v18 = vpop.eup %2020  ;;  %v1550_v23 = vmul.f32 %v2019_v17, %v2514_v37  ;;  %2040 = vrcp.f32 %v1536_v14  ;;  %v1621_v37 = vsel %vm1618_vm1, %v1930_v19, %v1934_v20 }
 0x4da   : > { %v2023_v24 = vpop.eup %2022  ;;  %v1531_v25 = vadd.f32 1.0, %v2021_v18 }
 0x4db   : > { %v1551_v29 = vmul.f32 %v2023_v24, %v2519_v44  ;;  %v1639_v30 = vadd.f32 %v1619_v27, %v1550_v23  ;;  %v1622_v44 = vsel %vm1618_vm1, %v1934_v20, %v1935_v31 }
 0x4dc   : > { %v2025_v22 = vpop.eup %2024  ;;  %2042 = vrcp.f32 %v1531_v25 }
 0x4dd   : > { %v1553_v38 = vmul.f32 %v2025_v22, %v2523_v52  ;;  %1651 = vst [vmem:[%s2568_s24] sm:$0xff] %v1639_v30  ;;  %v1640_v39 = vadd.f32 %v1620_v28, %v1551_v29 }
 0x4df   : > { %v2027_v45 = vpop.eup %2026  ;;  %1652 = vst [vmem:[%s2568_s24 + $0x8] sm:$0xff] %v1640_v39  ;;  %v1642_v46 = vadd.f32 %v1621_v37, %v1553_v38 }
 0x4e0   : > { %v2029_v47 = vpop.eup %2028  ;;  %v1554_v48 = vmul.f32 %v2027_v45, %v2527_v1 }
 0x4e1   : > { %v2031_v51 = vpop.eup %2030  ;;  %v1556_v52 = vmul.f32 %v2029_v47, %v2529_v7  ;;  %1655 = vst [vmem:[%s2568_s24 + $0x18] sm:$0xff] %v1642_v46 }
 0x4e2   : > { %v2033_v53 = vpop.eup %2032  ;;  %v1643_v54 = vadd.f32 %v1622_v44, %v1554_v48  ;;  %v1558_v42 = vmul.f32 %v2031_v51, %v2532_v11 }
 0x4e3   : > { %v2035_v57 = vpop.eup %2034  ;;  %v1557_v1 = vmul.f32 %v2033_v53, %v2535_v16  ;;  %v1645_v58 = vadd.f32 %v1623_v49, %v1556_v52 }
 0x4e4   : > { %v2037_v59 = vpop.eup %2036  ;;  %v1552_v60 = vmul.f32 %v2035_v57, %v2538_v21  ;;  %1656 = vst [vmem:[%s2568_s24 + $0x20] sm:$0xff] %v1643_v54  ;;  %v1647_v7 = vadd.f32 %v1944_v41, %v1558_v42 }
 0x4e5   : > { %v2039_v62 = vpop.eup %2038  ;;  %v1559_v11 = vmul.f32 %v2037_v59, %v2541_v26  ;;  %1658 = vst [vmem:[%s2568_s24 + $0x30] sm:$0xff] %v1645_v58  ;;  %v1646_v63 = vadd.f32 %v1624_v55, %v1557_v1 }
 0x4e6   : > { %v2041_v16 = vpop.eup %2040  ;;  %v1641_v0 = vadd.f32 %v1929_v13, %v1552_v60  ;;  %1660 = vst.msk [vmem:[%s2568_s24 + $0x40] sm:$0xff] %vm1653_vm2, %v1647_v7  ;;  %v1561_v21 = vmul.f32 %v2039_v62, %v2544_v32 }
 0x4e7   : > { %v1560_v3 = vmul.f32 %v2041_v16, %v2547_v34  ;;  %1659 = vst [vmem:[%s2568_s24 + $0x38] sm:$0xff] %v1646_v63  ;;  %v1648_v4 = vadd.f32 %v1625_v61, %v1559_v11 }
 0x4e8   : > { %1654 = vst.msk [vmem:[%s2568_s24 + $0x10] sm:$0xff] %vm1653_vm2, %v1641_v0  ;;  %v1650_v26 = vadd.f32 %v1950_v56, %v1561_v21 }
 0x4e9   : > { %v2043_v5 = vpop.eup %2042  ;;  %v1649_v8 = vadd.f32 %v1626_v2, %v1560_v3  ;;  %1661 = vst [vmem:[%s2568_s24 + $0x48] sm:$0xff] %v1648_v4 }
 0x4ea   : > { %v1555_v9 = vmul.f32 %v2043_v5, %v2552_v43  ;;  %1663 = vst.msk [vmem:[%s2568_s24 + $0x58] sm:$0xff] %vm1653_vm2, %v1650_v26 }
 0x4eb   : > { %1662 = vst [vmem:[%s2568_s24 + $0x50] sm:$0xff] %v1649_v8 }
 0x4ec   : > { %v1644_v10 = vadd.f32 %v1935_v31, %v1555_v9 }
 0x4ee   : > { %1657 = vst.msk [vmem:[%s2568_s24 + $0x28] sm:$0xff] %vm1653_vm2, %v1644_v10 }
 0x4ef PF: > { %s16_s21 = sadd.s32 1, %s2050_s21  }
 0x4f0   : > { %p13_p4 = scmp.ge.s32.totalorder %s16_s21, 4  }
 0x4f2   :  { %15 = sbr.rel (!%p13_p4) target bundleno = 1 (0x1), region = 78 }

</bundles_post_ra>
